<compile_context>
chip_gen: v7x
topology: tpu7x:2x2x1
jax: 0.10.0
libtpu: 0.0.40
codegen_flags: <defaults>
</compile_context>

<pallas_src>
import jax
import jax.numpy as jnp
from jax import lax
from jax.experimental import pallas as pl
from jax.experimental.pallas import tpu as pltpu

EMBED = 32            # config['EMBEDDING-SIZE']
HEADS = 8             # Block() hard-codes heads=8
HEAD_DIM = EMBED // HEADS
N_BLOCKS = 2          # config['TR-BLOCK-SIZE'] (number of transformer Blocks)
VOCAB = 64
HIDDEN = 4 * EMBED
EPS = 1e-5            # nn.LayerNorm default eps
SCALE = float(EMBED) ** 0.5
LOGIT_PAD = ((VOCAB + 127) // 128) * 128   # lane-dense logits (128)


def _layernorm(x, gamma, beta):
    mean = jnp.mean(x, axis=-1, keepdims=True)
    var = jnp.mean(jnp.square(x - mean), axis=-1, keepdims=True)
    return (x - mean) * lax.rsqrt(var + EPS) * gamma + beta


def _pick_tile(n, candidates):
    for c in candidates:
        if n % c == 0:
            return c
    return n   # fallback: single full-size tile (allowed: block == full dim)


# ----------------------------------------------------------------- kernels ---
def _attn_step(xq, xkv_ref, m_ref, kb_ref, wv_ref, qm_sc, m_sc, l_sc, acc_sc):
    """One online-softmax step over a KV tile (kv axis = grid axis 1)."""
    j = pl.program_id(1)

    @pl.when(j == 0)
    def _init():
        # Hoisted per-query-tile work: (xq @ M) + kb, computed once per q tile.
        qm_sc[...] = jnp.dot(xq.astype(jnp.bfloat16), m_ref[...],
                             preferred_element_type=jnp.float32) + kb_ref[...]
        m_sc[...] = jnp.full_like(m_sc, -jnp.inf)
        l_sc[...] = jnp.zeros_like(l_sc)
        acc_sc[...] = jnp.zeros_like(acc_sc)

    xkv_b = xkv_ref[...].astype(jnp.bfloat16)                        # (tkv, C)
    # scores (folded q/k projections):  s_ij = (x_i M + kb) . x_j
    s = lax.dot_general(qm_sc[...].astype(jnp.bfloat16), xkv_b,
                        (((1,), (1,)), ((), ())),
                        preferred_element_type=jnp.float32)          # (tq, tkv)

    m_prev = m_sc[...]
    m_new = jnp.maximum(m_prev, jnp.max(s, axis=-1, keepdims=True))
    alpha = jnp.exp(m_prev - m_new)
    p = jnp.exp(s - m_new)                                           # f32 (tq, tkv)
    l_sc[...] = alpha * l_sc[...] + jnp.sum(p, axis=-1, keepdims=True)
    v = jnp.dot(xkv_b, wv_ref[...], preferred_element_type=jnp.float32)   # (tkv, C)
    acc_sc[...] = alpha * acc_sc[...] + jnp.dot(
        p.astype(jnp.bfloat16), v.astype(jnp.bfloat16),
        preferred_element_type=jnp.float32)
    m_sc[...] = m_new


def _block_tail(xq, bv, g1, be1, w1, b1, w2, b2, g2, be2, l_sc, acc_sc):
    """Finalize attention + LN1 + residual + FFN + LN2 + residual for one q tile."""
    # rows of att sum to 1, so the (lane-tiled) value bias passes straight through.
    y = acc_sc[...] * pl.reciprocal(l_sc[...], approx=True) + bv
    x1 = xq + _layernorm(y, g1, be1)
    h = jnp.dot(x1.astype(jnp.bfloat16), w1, preferred_element_type=jnp.float32) + b1
    h = jnp.maximum(h, 0.0)
    # TODO(synk): nn.Dropout(p=0.2) is stochastic; implemented as eval-mode identity.
    f = jnp.dot(h.astype(jnp.bfloat16), w2, preferred_element_type=jnp.float32) + b2
    return x1 + _layernorm(f, g2, be2)


def block_kernel(xq_ref, xkv_ref, m_ref, kb_ref, wv_ref, bv_ref,
                 g1_ref, be1_ref, w1_ref, b1_ref, w2_ref, b2_ref,
                 g2_ref, be2_ref, o_ref, qm_sc, m_sc, l_sc, acc_sc):
    xq = xq_ref[...]
    _attn_step(xq, xkv_ref, m_ref, kb_ref, wv_ref, qm_sc, m_sc, l_sc, acc_sc)

    @pl.when(pl.program_id(1) == pl.num_programs(1) - 1)
    def _finalize():
        o_ref[...] = _block_tail(xq, bv_ref[...], g1_ref[...], be1_ref[...],
                                 w1_ref[...], b1_ref[...], w2_ref[...], b2_ref[...],
                                 g2_ref[...], be2_ref[...], l_sc, acc_sc)


def block_final_kernel(xq_ref, xkv_ref, m_ref, kb_ref, wv_ref, bv_ref,
                       g1_ref, be1_ref, w1_ref, b1_ref, w2_ref, b2_ref,
                       g2_ref, be2_ref, gf_ref, bef_ref, wf_ref, bfb_ref,
                       o_ref, qm_sc, m_sc, l_sc, acc_sc):
    xq = xq_ref[...]
    _attn_step(xq, xkv_ref, m_ref, kb_ref, wv_ref, qm_sc, m_sc, l_sc, acc_sc)

    @pl.when(pl.program_id(1) == pl.num_programs(1) - 1)
    def _finalize():
        x2 = _block_tail(xq, bv_ref[...], g1_ref[...], be1_ref[...],
                         w1_ref[...], b1_ref[...], w2_ref[...], b2_ref[...],
                         g2_ref[...], be2_ref[...], l_sc, acc_sc)
        xn = _layernorm(x2, gf_ref[...], bef_ref[...])
        o_ref[...] = jnp.dot(xn.astype(jnp.bfloat16), wf_ref[...],
                             preferred_element_type=jnp.float32) + bfb_ref[...]


# ----------------------------------------------------------------- wrapper ---
def _block_call(x, blk, final=None):
    N, C = x.shape
    tq = _pick_tile(N, (512, 256, 128, 64, 32, 16, 8))
    tkv = _pick_tile(N, (512, 256, 128, 64, 32, 16, 8))
    grid = (N // tq, N // tkv)

    def _w(shape):
        return pl.BlockSpec(shape, lambda i, j: (0, 0))   # weight: resident, DMA'd once

    in_specs = [
        pl.BlockSpec((tq, C), lambda i, j: (i, 0)),       # x  (query rows)
        pl.BlockSpec((tkv, C), lambda i, j: (j, 0)),      # x  (key/value rows)
        _w((C, C)), _w((1, C)),                           # M, kb
        _w((C, C)), _w((1, C)),                           # wv_full, bv_full
        _w((1, C)), _w((1, C)),                           # g1, be1
        _w((C, HIDDEN)), _w((1, HIDDEN)),                 # w1, b1
        _w((HIDDEN, C)), _w((1, C)),                      # w2, b2
        _w((1, C)), _w((1, C)),                           # g2, be2
    ]
    args = [x, x, blk["m"], blk["kb"], blk["wv_full"], blk["bv_full"],
            blk["g1"], blk["be1"], blk["w1"], blk["b1"],
            blk["w2"], blk["b2"], blk["g2"], blk["be2"]]

    if final is not None:
        gf, bef, wf, bfb = final
        in_specs += [_w((1, C)), _w((1, C)), _w((C, LOGIT_PAD)), _w((1, LOGIT_PAD))]
        args += [gf, bef, wf, bfb]
        kernel = block_final_kernel
        out_shape = jax.ShapeDtypeStruct((N, LOGIT_PAD), jnp.float32)
        out_spec = pl.BlockSpec((tq, LOGIT_PAD), lambda i, j: (i, 0))
        extra_flops = 2 * N * C * LOGIT_PAD
    else:
        kernel = block_kernel
        out_shape = jax.ShapeDtypeStruct((N, C), jnp.float32)
        out_spec = pl.BlockSpec((tq, C), lambda i, j: (i, 0))
        extra_flops = 0

    flops = (2 * N * C * C            # x @ M
             + 2 * N * N * C          # scores
             + 2 * N * C * C          # value projection
             + 2 * N * N * C          # att @ v
             + 4 * N * C * HIDDEN     # FFN
             + extra_flops)
    cost = pl.CostEstimate(flops=flops,
                           transcendentals=N * N + 2 * N,
                           bytes_accessed=2 * N * C * 4 + 64 * 1024)

    return pl.pallas_call(
        kernel,
        out_shape=out_shape,
        grid_spec=pltpu.PrefetchScalarGridSpec(
            num_scalar_prefetch=0,
            grid=grid,
            in_specs=in_specs,
            out_specs=out_spec,
            scratch_shapes=[
                pltpu.VMEM((tq, C), jnp.float32),   # qm (hoisted per q tile)
                pltpu.VMEM((tq, 1), jnp.float32),   # running max
                pltpu.VMEM((tq, 1), jnp.float32),   # running denom
                pltpu.VMEM((tq, C), jnp.float32),   # output accumulator
            ],
        ),
        compiler_params=pltpu.CompilerParams(
            dimension_semantics=("parallel", "arbitrary"),
            vmem_limit_bytes=32 * 1024 * 1024,
        ),
        cost_estimate=cost,
    )(*args)


def init_params(key, vocab=VOCAB):
    keys = iter(jax.random.split(key, 64))

    def nrm(shape):
        return (0.02 * jax.random.normal(next(keys), shape)).astype(jnp.float32)

    def unif(shape, fan_in):
        bound = 1.0 / (fan_in ** 0.5)
        return jax.random.uniform(next(keys), shape, jnp.float32, -bound, bound)

    tok_table = nrm((vocab, EMBED))       # token_embedding_table
    pos_table = nrm((vocab, EMBED))       # PositionalEncoding.embed
    freq = jnp.power(10000.0, jnp.arange(EMBED, dtype=jnp.float32) * (2.0 / EMBED))

    final_w = nrm((vocab, EMBED))         # torch Linear weight (out, in)
    final_b = unif((1, vocab), EMBED)

    params = {
        # positional encoding folded into the gather table (same index for both)
        "embed_table": tok_table + jnp.sin(pos_table / freq),
        "blocks": [],
        "final_gamma": jnp.ones((1, EMBED), jnp.float32),
        "final_beta": jnp.zeros((1, EMBED), jnp.float32),
        "final_w_pad": jnp.zeros((EMBED, LOGIT_PAD), jnp.float32)
                          .at[:, :vocab].set(final_w.T).astype(jnp.bfloat16),
        "final_b_pad": jnp.zeros((1, LOGIT_PAD), jnp.float32).at[:, :vocab].set(final_b),
    }

    for _ in range(N_BLOCKS):
        wq = nrm((HEAD_DIM, EMBED)); bq = unif((1, HEAD_DIM), EMBED)
        wk = nrm((HEAD_DIM, EMBED)); bk = unif((1, HEAD_DIM), EMBED)   # noqa: F841 (per-query bias cancels in softmax)
        wv = nrm((HEAD_DIM, EMBED)); bv = unif((1, HEAD_DIM), EMBED)
        w1 = nrm((HIDDEN, EMBED));   b1 = unif((1, HIDDEN), EMBED)
        w2 = nrm((EMBED, HIDDEN));   b2 = unif((1, EMBED), HIDDEN)
        # Fold q/k projections + scale:  s = x M x^T + 1 (x kb)^T  (mod per-row shift)
        m = (wq.T @ wk) / SCALE               # (C, C)
        kb = (bq @ wk) / SCALE                # (1, C)  == (Wk^T bq)^T / sqrt(C)
        params["blocks"].append(dict(
            m=m.astype(jnp.bfloat16), kb=kb,
            wv_full=jnp.tile(wv.T, (1, HEADS)).astype(jnp.bfloat16),   # (C, C): 8 identical heads
            bv_full=jnp.tile(bv, (1, HEADS)),                          # (1, C)
            g1=jnp.ones((1, EMBED), jnp.float32), be1=jnp.zeros((1, EMBED), jnp.float32),
            w1=w1.T.astype(jnp.bfloat16), b1=b1,
            w2=w2.T.astype(jnp.bfloat16), b2=b2,
            g2=jnp.ones((1, EMBED), jnp.float32), be2=jnp.zeros((1, EMBED), jnp.float32),
        ))
    return params


@jax.jit
def gpt_forward(params, idx):
    B, T = idx.shape
    # token embedding + folded positional encoding: one gather (glue)
    x = jnp.take(params["embed_table"], idx.reshape(-1), axis=0)       # (N, C)

    blocks = params["blocks"]
    for blk in blocks[:-1]:
        x = _block_call(x, blk)
    logits_pad = _block_call(
        x, blocks[-1],
        final=(params["final_gamma"], params["final_beta"],
               params["final_w_pad"], params["final_b_pad"]))

    logits = logits_pad[:, :VOCAB].reshape(B, T, VOCAB)
    # targets=None path of gpt_model.forward -> (logits, None)
    return logits, None


# --------------------------------------------------- pure-JAX f32 reference ---
def gpt_forward_ref(params, idx):
    """f32 reference mirroring gpt_model.forward (uses the same folded params)."""
    B, T = idx.shape
    x = jnp.take(params["embed_table"], idx.reshape(-1), axis=0)
    for blk in params["blocks"]:
        qm = x @ blk["m"].astype(jnp.float32) + blk["kb"]
        att = jax.nn.softmax(qm @ x.T, axis=-1)
        v = x @ blk["wv_full"].astype(jnp.float32)
        y = att @ v + blk["bv_full"]
        x = x + _layernorm(y, blk["g1"], blk["be1"])
        h = jnp.maximum(x @ blk["w1"].astype(jnp.float32) + blk["b1"], 0.0)
        f = h @ blk["w2"].astype(jnp.float32) + blk["b2"]
        x = x + _layernorm(f, blk["g2"], blk["be2"])
    xn = _layernorm(x, params["final_gamma"], params["final_beta"])
    logits = xn @ params["final_w_pad"].astype(jnp.float32) + params["final_b_pad"]
    return logits[:, :VOCAB].reshape(B, T, VOCAB)


if __name__ == "__main__":
    key = jax.random.PRNGKey(0)
    pkey, ikey = jax.random.split(key)
    params = init_params(pkey)

    B, T = 2, 8
    idx = jax.random.randint(ikey, (B, T), 0, VOCAB, dtype=jnp.int32)

    logits, loss = gpt_forward(params, idx)
    logits = jax.block_until_ready(logits)
    assert logits.shape == (B, T, VOCAB) and loss is None
    assert bool(jnp.all(jnp.isfinite(logits)))

    ref = gpt_forward_ref(params, idx)
    err = float(jnp.max(jnp.abs(logits - ref)))
    assert err < 5e-2, f"max |kernel - reference| too large: {err}"
    print("KERNEL_OK")
</pallas_src>

<mosaic_0001>
module attributes {stable_mosaic.version = 11 : i64} {
  func.func @block_kernel(%arg0: i32, %arg1: i32, %arg2: memref<16x32xf32, #tpu.memory_space<vmem>>, %arg3: memref<16x32xf32, #tpu.memory_space<vmem>>, %arg4: memref<32x32xbf16, #tpu.memory_space<vmem>>, %arg5: memref<1x32xf32, #tpu.memory_space<vmem>>, %arg6: memref<32x32xbf16, #tpu.memory_space<vmem>>, %arg7: memref<1x32xf32, #tpu.memory_space<vmem>>, %arg8: memref<1x32xf32, #tpu.memory_space<vmem>>, %arg9: memref<1x32xf32, #tpu.memory_space<vmem>>, %arg10: memref<32x128xbf16, #tpu.memory_space<vmem>>, %arg11: memref<1x128xf32, #tpu.memory_space<vmem>>, %arg12: memref<128x32xbf16, #tpu.memory_space<vmem>>, %arg13: memref<1x32xf32, #tpu.memory_space<vmem>>, %arg14: memref<1x32xf32, #tpu.memory_space<vmem>>, %arg15: memref<1x32xf32, #tpu.memory_space<vmem>>, %arg16: memref<16x32xf32, #tpu.memory_space<vmem>>, %arg17: memref<16x32xf32, #tpu.memory_space<vmem>>, %arg18: memref<16x1xf32, #tpu.memory_space<vmem>>, %arg19: memref<16x1xf32, #tpu.memory_space<vmem>>, %arg20: memref<16x32xf32, #tpu.memory_space<vmem>>) attributes {dimension_semantics = [#tpu.dimension_semantics<parallel>, #tpu.dimension_semantics<arbitrary>], iteration_bounds = array<i64: 1, 1>, scalar_prefetch = 0 : i64, scratch_operands = 4 : i64, tpu.core_type = #tpu.core_type<tc>, window_params = [{transform_indices = @transform_0, window_bounds = array<i64: 16, 32>}, {transform_indices = @transform_1, window_bounds = array<i64: 16, 32>}, {pipeline_mode = #tpu.pipeline_mode<synchronous>, transform_indices = @transform_2, window_bounds = array<i64: 32, 32>}, {pipeline_mode = #tpu.pipeline_mode<synchronous>, transform_indices = @transform_3, window_bounds = array<i64: 1, 32>}, {pipeline_mode = #tpu.pipeline_mode<synchronous>, transform_indices = @transform_4, window_bounds = array<i64: 32, 32>}, {pipeline_mode = #tpu.pipeline_mode<synchronous>, transform_indices = @transform_5, window_bounds = array<i64: 1, 32>}, {pipeline_mode = #tpu.pipeline_mode<synchronous>, transform_indices = @transform_6, window_bounds = array<i64: 1, 32>}, {pipeline_mode = #tpu.pipeline_mode<synchronous>, transform_indices = @transform_7, window_bounds = array<i64: 1, 32>}, {pipeline_mode = #tpu.pipeline_mode<synchronous>, transform_indices = @transform_8, window_bounds = array<i64: 32, 128>}, {pipeline_mode = #tpu.pipeline_mode<synchronous>, transform_indices = @transform_9, window_bounds = array<i64: 1, 128>}, {pipeline_mode = #tpu.pipeline_mode<synchronous>, transform_indices = @transform_10, window_bounds = array<i64: 128, 32>}, {pipeline_mode = #tpu.pipeline_mode<synchronous>, transform_indices = @transform_11, window_bounds = array<i64: 1, 32>}, {pipeline_mode = #tpu.pipeline_mode<synchronous>, transform_indices = @transform_12, window_bounds = array<i64: 1, 32>}, {pipeline_mode = #tpu.pipeline_mode<synchronous>, transform_indices = @transform_13, window_bounds = array<i64: 1, 32>}, {transform_indices = @transform_14, window_bounds = array<i64: 16, 32>}]} {
    %c0 = arith.constant 0 : index
    %c0_0 = arith.constant 0 : index
    %0 = vector.load %arg2[%c0, %c0_0] : memref<16x32xf32, #tpu.memory_space<vmem>>, vector<16x32xf32>
    %c0_i32 = arith.constant 0 : i32
    %1 = arith.cmpi eq, %arg1, %c0_i32 : i32
    %2 = arith.extui %1 : i1 to i32
    %c0_i32_1 = arith.constant 0 : i32
    %3 = arith.cmpi ne, %2, %c0_i32_1 : i32
    scf.if %3 {
      %38 = arith.truncf %0 : vector<16x32xf32> to vector<16x32xbf16>
      %c0_26 = arith.constant 0 : index
      %c0_27 = arith.constant 0 : index
      %39 = vector.load %arg4[%c0_26, %c0_27] : memref<32x32xbf16, #tpu.memory_space<vmem>>, vector<32x32xbf16>
      %cst_28 = arith.constant dense<0.000000e+00> : vector<16x32xf32>
      %40 = tpu.matmul %38, %39, %cst_28 {dimension_numbers = #tpu.dot_dimension_numbers<[1], [0], [0], [1], [0, 0, 1, 1], [], []>} : vector<16x32xbf16>, vector<32x32xbf16>, vector<16x32xf32> -> vector<16x32xf32>
      %c0_29 = arith.constant 0 : index
      %c0_30 = arith.constant 0 : index
      %41 = vector.load %arg5[%c0_29, %c0_30] : memref<1x32xf32, #tpu.memory_space<vmem>>, vector<1x32xf32>
      %42 = vector.broadcast %41 : vector<1x32xf32> to vector<16x32xf32>
      %43 = arith.addf %40, %42 : vector<16x32xf32>
      %c0_31 = arith.constant 0 : index
      %c0_32 = arith.constant 0 : index
      %44 = vector.load %arg17[%c0_31, %c0_32] : memref<16x32xf32, #tpu.memory_space<vmem>>, vector<16x32xf32>
      tpu.vector_store %arg17[%c0_31, %c0_32], %43 {strides = array<i32>} : memref<16x32xf32, #tpu.memory_space<vmem>>, vector<16x32xf32>,
      %cst_33 = arith.constant 0xFF800000 : f32
      %45 = vector.broadcast %cst_33 : f32 to vector<16x1xf32>
      %c0_34 = arith.constant 0 : index
      %c0_35 = arith.constant 0 : index
      %46 = vector.load %arg18[%c0_34, %c0_35] : memref<16x1xf32, #tpu.memory_space<vmem>>, vector<16x1xf32>
      tpu.vector_store %arg18[%c0_34, %c0_35], %45 {strides = array<i32>} : memref<16x1xf32, #tpu.memory_space<vmem>>, vector<16x1xf32>,
      %cst_36 = arith.constant 0.000000e+00 : f32
      %47 = vector.broadcast %cst_36 : f32 to vector<16x1xf32>
      %c0_37 = arith.constant 0 : index
      %c0_38 = arith.constant 0 : index
      %48 = vector.load %arg19[%c0_37, %c0_38] : memref<16x1xf32, #tpu.memory_space<vmem>>, vector<16x1xf32>
      tpu.vector_store %arg19[%c0_37, %c0_38], %47 {strides = array<i32>} : memref<16x1xf32, #tpu.memory_space<vmem>>, vector<16x1xf32>,
      %cst_39 = arith.constant 0.000000e+00 : f32
      %49 = vector.broadcast %cst_39 : f32 to vector<16x32xf32>
      %c0_40 = arith.constant 0 : index
      %c0_41 = arith.constant 0 : index
      %50 = vector.load %arg20[%c0_40, %c0_41] : memref<16x32xf32, #tpu.memory_space<vmem>>, vector<16x32xf32>
      tpu.vector_store %arg20[%c0_40, %c0_41], %49 {strides = array<i32>} : memref<16x32xf32, #tpu.memory_space<vmem>>, vector<16x32xf32>,
    } else {
    }
    %c0_2 = arith.constant 0 : index
    %c0_3 = arith.constant 0 : index
    %4 = vector.load %arg3[%c0_2, %c0_3] : memref<16x32xf32, #tpu.memory_space<vmem>>, vector<16x32xf32>
    %5 = arith.truncf %4 : vector<16x32xf32> to vector<16x32xbf16>
    %c0_4 = arith.constant 0 : index
    %c0_5 = arith.constant 0 : index
    %6 = vector.load %arg17[%c0_4, %c0_5] : memref<16x32xf32, #tpu.memory_space<vmem>>, vector<16x32xf32>
    %7 = arith.truncf %6 : vector<16x32xf32> to vector<16x32xbf16>
    %cst = arith.constant dense<0.000000e+00> : vector<16x16xf32>
    %8 = tpu.matmul %7, %5, %cst {dimension_numbers = #tpu.dot_dimension_numbers<[1], [1], [0], [0], [0, 0, 1, 0], [], []>} : vector<16x32xbf16>, vector<16x32xbf16>, vector<16x16xf32> -> vector<16x16xf32>
    %c0_6 = arith.constant 0 : index
    %c0_7 = arith.constant 0 : index
    %9 = vector.load %arg18[%c0_6, %c0_7] : memref<16x1xf32, #tpu.memory_space<vmem>>, vector<16x1xf32>
    %cst_8 = arith.constant dense<0xFF800000> : vector<16xf32>
    %10 = vector.multi_reduction <maximumf>, %8, %cst_8 [1] : vector<16x16xf32> to vector<16xf32>
    %11 = vector.shape_cast %10 : vector<16xf32> to vector<16x1xf32>
    %12 = arith.maximumf %9, %11 : vector<16x1xf32>
    %13 = arith.subf %9, %12 : vector<16x1xf32>
    %14 = math.exp %13 : vector<16x1xf32>
    %15 = vector.broadcast %12 : vector<16x1xf32> to vector<16x16xf32>
    %16 = arith.subf %8, %15 : vector<16x16xf32>
    %17 = math.exp %16 : vector<16x16xf32>
    %c0_9 = arith.constant 0 : index
    %c0_10 = arith.constant 0 : index
    %18 = vector.load %arg19[%c0_9, %c0_10] : memref<16x1xf32, #tpu.memory_space<vmem>>, vector<16x1xf32>
    %19 = arith.mulf %14, %18 : vector<16x1xf32>
    %cst_11 = arith.constant dense<0.000000e+00> : vector<16xf32>
    %20 = vector.multi_reduction <add>, %17, %cst_11 [1] : vector<16x16xf32> to vector<16xf32>
    %21 = vector.shape_cast %20 : vector<16xf32> to vector<16x1xf32>
    %22 = arith.addf %19, %21 : vector<16x1xf32>
    %c0_12 = arith.constant 0 : index
    %c0_13 = arith.constant 0 : index
    %23 = vector.load %arg19[%c0_12, %c0_13] : memref<16x1xf32, #tpu.memory_space<vmem>>, vector<16x1xf32>
    tpu.vector_store %arg19[%c0_12, %c0_13], %22 {strides = array<i32>} : memref<16x1xf32, #tpu.memory_space<vmem>>, vector<16x1xf32>,
    %c0_14 = arith.constant 0 : index
    %c0_15 = arith.constant 0 : index
    %24 = vector.load %arg6[%c0_14, %c0_15] : memref<32x32xbf16, #tpu.memory_space<vmem>>, vector<32x32xbf16>
    %cst_16 = arith.constant dense<0.000000e+00> : vector<16x32xf32>
    %25 = tpu.matmul %5, %24, %cst_16 {dimension_numbers = #tpu.dot_dimension_numbers<[1], [0], [0], [1], [0, 0, 1, 1], [], []>} : vector<16x32xbf16>, vector<32x32xbf16>, vector<16x32xf32> -> vector<16x32xf32>
    %c0_17 = arith.constant 0 : index
    %c0_18 = arith.constant 0 : index
    %26 = vector.load %arg20[%c0_17, %c0_18] : memref<16x32xf32, #tpu.memory_space<vmem>>, vector<16x32xf32>
    %27 = vector.broadcast %14 : vector<16x1xf32> to vector<16x32xf32>
    %28 = arith.mulf %27, %26 : vector<16x32xf32>
    %29 = arith.truncf %17 : vector<16x16xf32> to vector<16x16xbf16>
    %30 = arith.truncf %25 : vector<16x32xf32> to vector<16x32xbf16>
    %cst_19 = arith.constant dense<0.000000e+00> : vector<16x32xf32>
    %31 = tpu.matmul %29, %30, %cst_19 {dimension_numbers = #tpu.dot_dimension_numbers<[1], [0], [0], [1], [0, 0, 1, 1], [], []>} : vector<16x16xbf16>, vector<16x32xbf16>, vector<16x32xf32> -> vector<16x32xf32>
    %32 = arith.addf %28, %31 : vector<16x32xf32>
    %c0_20 = arith.constant 0 : index
    %c0_21 = arith.constant 0 : index
    %33 = vector.load %arg20[%c0_20, %c0_21] : memref<16x32xf32, #tpu.memory_space<vmem>>, vector<16x32xf32>
    tpu.vector_store %arg20[%c0_20, %c0_21], %32 {strides = array<i32>} : memref<16x32xf32, #tpu.memory_space<vmem>>, vector<16x32xf32>,
    %c0_22 = arith.constant 0 : index
    %c0_23 = arith.constant 0 : index
    %34 = vector.load %arg18[%c0_22, %c0_23] : memref<16x1xf32, #tpu.memory_space<vmem>>, vector<16x1xf32>
    tpu.vector_store %arg18[%c0_22, %c0_23], %12 {strides = array<i32>} : memref<16x1xf32, #tpu.memory_space<vmem>>, vector<16x1xf32>,
    %c0_i32_24 = arith.constant 0 : i32
    %35 = arith.cmpi eq, %arg1, %c0_i32_24 : i32
    %36 = arith.extui %35 : i1 to i32
    %c0_i32_25 = arith.constant 0 : i32
    %37 = arith.cmpi ne, %36, %c0_i32_25 : i32
    scf.if %37 {
      %c0_26 = arith.constant 0 : index
      %c0_27 = arith.constant 0 : index
      %38 = vector.load %arg7[%c0_26, %c0_27] : memref<1x32xf32, #tpu.memory_space<vmem>>, vector<1x32xf32>
      %c0_28 = arith.constant 0 : index
      %c0_29 = arith.constant 0 : index
      %39 = vector.load %arg8[%c0_28, %c0_29] : memref<1x32xf32, #tpu.memory_space<vmem>>, vector<1x32xf32>
      %c0_30 = arith.constant 0 : index
      %c0_31 = arith.constant 0 : index
      %40 = vector.load %arg9[%c0_30, %c0_31] : memref<1x32xf32, #tpu.memory_space<vmem>>, vector<1x32xf32>
      %c0_32 = arith.constant 0 : index
      %c0_33 = arith.constant 0 : index
      %41 = vector.load %arg10[%c0_32, %c0_33] : memref<32x128xbf16, #tpu.memory_space<vmem>>, vector<32x128xbf16>
      %c0_34 = arith.constant 0 : index
      %c0_35 = arith.constant 0 : index
      %42 = vector.load %arg11[%c0_34, %c0_35] : memref<1x128xf32, #tpu.memory_space<vmem>>, vector<1x128xf32>
      %c0_36 = arith.constant 0 : index
      %c0_37 = arith.constant 0 : index
      %43 = vector.load %arg12[%c0_36, %c0_37] : memref<128x32xbf16, #tpu.memory_space<vmem>>, vector<128x32xbf16>
      %c0_38 = arith.constant 0 : index
      %c0_39 = arith.constant 0 : index
      %44 = vector.load %arg13[%c0_38, %c0_39] : memref<1x32xf32, #tpu.memory_space<vmem>>, vector<1x32xf32>
      %c0_40 = arith.constant 0 : index
      %c0_41 = arith.constant 0 : index
      %45 = vector.load %arg14[%c0_40, %c0_41] : memref<1x32xf32, #tpu.memory_space<vmem>>, vector<1x32xf32>
      %c0_42 = arith.constant 0 : index
      %c0_43 = arith.constant 0 : index
      %46 = vector.load %arg15[%c0_42, %c0_43] : memref<1x32xf32, #tpu.memory_space<vmem>>, vector<1x32xf32>
      %c0_44 = arith.constant 0 : index
      %c0_45 = arith.constant 0 : index
      %47 = vector.load %arg20[%c0_44, %c0_45] : memref<16x32xf32, #tpu.memory_space<vmem>>, vector<16x32xf32>
      %c0_46 = arith.constant 0 : index
      %c0_47 = arith.constant 0 : index
      %48 = vector.load %arg19[%c0_46, %c0_47] : memref<16x1xf32, #tpu.memory_space<vmem>>, vector<16x1xf32>
      %49 = tpu.reciprocal %48 {approx = true} : vector<16x1xf32> -> vector<16x1xf32>
      %50 = vector.broadcast %49 : vector<16x1xf32> to vector<16x32xf32>
      %51 = arith.mulf %47, %50 : vector<16x32xf32>
      %52 = vector.broadcast %38 : vector<1x32xf32> to vector<16x32xf32>
      %53 = arith.addf %51, %52 : vector<16x32xf32>
      %cst_48 = arith.constant dense<0.000000e+00> : vector<16xf32>
      %54 = vector.multi_reduction <add>, %53, %cst_48 [1] : vector<16x32xf32> to vector<16xf32>
      %55 = vector.shape_cast %54 : vector<16xf32> to vector<16x1xf32>
      %cst_49 = arith.constant 3.200000e+01 : f32
      %56 = vector.broadcast %cst_49 : f32 to vector<16x1xf32>
      %57 = arith.divf %55, %56 : vector<16x1xf32>
      %58 = vector.broadcast %57 : vector<16x1xf32> to vector<16x32xf32>
      %59 = arith.subf %53, %58 : vector<16x32xf32>
      %60 = arith.mulf %59, %59 : vector<16x32xf32>
      %cst_50 = arith.constant dense<0.000000e+00> : vector<16xf32>
      %61 = vector.multi_reduction <add>, %60, %cst_50 [1] : vector<16x32xf32> to vector<16xf32>
      %62 = vector.shape_cast %61 : vector<16xf32> to vector<16x1xf32>
      %cst_51 = arith.constant 3.200000e+01 : f32
      %63 = vector.broadcast %cst_51 : f32 to vector<16x1xf32>
      %64 = arith.divf %62, %63 : vector<16x1xf32>
      %65 = vector.broadcast %57 : vector<16x1xf32> to vector<16x32xf32>
      %66 = arith.subf %53, %65 : vector<16x32xf32>
      %cst_52 = arith.constant 9.99999974E-6 : f32
      %67 = vector.broadcast %cst_52 : f32 to vector<16x1xf32>
      %68 = arith.addf %64, %67 : vector<16x1xf32>
      %69 = math.rsqrt %68 : vector<16x1xf32>
      %70 = vector.broadcast %69 : vector<16x1xf32> to vector<16x32xf32>
      %71 = arith.mulf %66, %70 : vector<16x32xf32>
      %72 = vector.broadcast %39 : vector<1x32xf32> to vector<16x32xf32>
      %73 = arith.mulf %71, %72 : vector<16x32xf32>
      %74 = vector.broadcast %40 : vector<1x32xf32> to vector<16x32xf32>
      %75 = arith.addf %73, %74 : vector<16x32xf32>
      %76 = arith.addf %0, %75 : vector<16x32xf32>
      %77 = arith.truncf %76 : vector<16x32xf32> to vector<16x32xbf16>
      %cst_53 = arith.constant dense<0.000000e+00> : vector<16x128xf32>
      %78 = tpu.matmul %77, %41, %cst_53 {dimension_numbers = #tpu.dot_dimension_numbers<[1], [0], [0], [1], [0, 0, 1, 1], [], []>} : vector<16x32xbf16>, vector<32x128xbf16>, vector<16x128xf32> -> vector<16x128xf32>
      %79 = vector.broadcast %42 : vector<1x128xf32> to vector<16x128xf32>
      %80 = arith.addf %78, %79 : vector<16x128xf32>
      %cst_54 = arith.constant 0.000000e+00 : f32
      %81 = vector.broadcast %cst_54 : f32 to vector<16x128xf32>
      %82 = arith.maximumf %80, %81 : vector<16x128xf32>
      %83 = arith.truncf %82 : vector<16x128xf32> to vector<16x128xbf16>
      %cst_55 = arith.constant dense<0.000000e+00> : vector<16x32xf32>
      %84 = tpu.matmul %83, %43, %cst_55 {dimension_numbers = #tpu.dot_dimension_numbers<[1], [0], [0], [1], [0, 0, 1, 1], [], []>} : vector<16x128xbf16>, vector<128x32xbf16>, vector<16x32xf32> -> vector<16x32xf32>
      %85 = vector.broadcast %44 : vector<1x32xf32> to vector<16x32xf32>
      %86 = arith.addf %84, %85 : vector<16x32xf32>
      %cst_56 = arith.constant dense<0.000000e+00> : vector<16xf32>
      %87 = vector.multi_reduction <add>, %86, %cst_56 [1] : vector<16x32xf32> to vector<16xf32>
      %88 = vector.shape_cast %87 : vector<16xf32> to vector<16x1xf32>
      %cst_57 = arith.constant 3.200000e+01 : f32
      %89 = vector.broadcast %cst_57 : f32 to vector<16x1xf32>
      %90 = arith.divf %88, %89 : vector<16x1xf32>
      %91 = vector.broadcast %90 : vector<16x1xf32> to vector<16x32xf32>
      %92 = arith.subf %86, %91 : vector<16x32xf32>
      %93 = arith.mulf %92, %92 : vector<16x32xf32>
      %cst_58 = arith.constant dense<0.000000e+00> : vector<16xf32>
      %94 = vector.multi_reduction <add>, %93, %cst_58 [1] : vector<16x32xf32> to vector<16xf32>
      %95 = vector.shape_cast %94 : vector<16xf32> to vector<16x1xf32>
      %cst_59 = arith.constant 3.200000e+01 : f32
      %96 = vector.broadcast %cst_59 : f32 to vector<16x1xf32>
      %97 = arith.divf %95, %96 : vector<16x1xf32>
      %98 = vector.broadcast %90 : vector<16x1xf32> to vector<16x32xf32>
      %99 = arith.subf %86, %98 : vector<16x32xf32>
      %cst_60 = arith.constant 9.99999974E-6 : f32
      %100 = vector.broadcast %cst_60 : f32 to vector<16x1xf32>
      %101 = arith.addf %97, %100 : vector<16x1xf32>
      %102 = math.rsqrt %101 : vector<16x1xf32>
      %103 = vector.broadcast %102 : vector<16x1xf32> to vector<16x32xf32>
      %104 = arith.mulf %99, %103 : vector<16x32xf32>
      %105 = vector.broadcast %45 : vector<1x32xf32> to vector<16x32xf32>
      %106 = arith.mulf %104, %105 : vector<16x32xf32>
      %107 = vector.broadcast %46 : vector<1x32xf32> to vector<16x32xf32>
      %108 = arith.addf %106, %107 : vector<16x32xf32>
      %109 = arith.addf %76, %108 : vector<16x32xf32>
      %c0_61 = arith.constant 0 : index
      %c0_62 = arith.constant 0 : index
      %110 = vector.load %arg16[%c0_61, %c0_62] : memref<16x32xf32, #tpu.memory_space<vmem>>, vector<16x32xf32>
      tpu.vector_store %arg16[%c0_61, %c0_62], %109 {strides = array<i32>} : memref<16x32xf32, #tpu.memory_space<vmem>>, vector<16x32xf32>,
    } else {
    }
    return
  }
  func.func @transform_0(%arg0: i32, %arg1: i32) -> (i32, i32) {
    %c0_i32 = arith.constant 0 : i32
    %c0_i32_0 = arith.constant 0 : i32
    return %arg0, %c0_i32 : i32, i32
  }
  func.func @transform_1(%arg0: i32, %arg1: i32) -> (i32, i32) {
    %c0_i32 = arith.constant 0 : i32
    %c0_i32_0 = arith.constant 0 : i32
    return %arg1, %c0_i32 : i32, i32
  }
  func.func @transform_2(%arg0: i32, %arg1: i32) -> (i32, i32) {
    %c0_i32 = arith.constant 0 : i32
    %c0_i32_0 = arith.constant 0 : i32
    %c0_i32_1 = arith.constant 0 : i32
    return %c0_i32, %c0_i32_0 : i32, i32
  }
  func.func @transform_3(%arg0: i32, %arg1: i32) -> (i32, i32) {
    %c0_i32 = arith.constant 0 : i32
    %c0_i32_0 = arith.constant 0 : i32
    %c0_i32_1 = arith.constant 0 : i32
    return %c0_i32, %c0_i32_0 : i32, i32
  }
  func.func @transform_4(%arg0: i32, %arg1: i32) -> (i32, i32) {
    %c0_i32 = arith.constant 0 : i32
    %c0_i32_0 = arith.constant 0 : i32
    %c0_i32_1 = arith.constant 0 : i32
    return %c0_i32, %c0_i32_0 : i32, i32
  }
  func.func @transform_5(%arg0: i32, %arg1: i32) -> (i32, i32) {
    %c0_i32 = arith.constant 0 : i32
    %c0_i32_0 = arith.constant 0 : i32
    %c0_i32_1 = arith.constant 0 : i32
    return %c0_i32, %c0_i32_0 : i32, i32
  }
  func.func @transform_6(%arg0: i32, %arg1: i32) -> (i32, i32) {
    %c0_i32 = arith.constant 0 : i32
    %c0_i32_0 = arith.constant 0 : i32
    %c0_i32_1 = arith.constant 0 : i32
    return %c0_i32, %c0_i32_0 : i32, i32
  }
  func.func @transform_7(%arg0: i32, %arg1: i32) -> (i32, i32) {
    %c0_i32 = arith.constant 0 : i32
    %c0_i32_0 = arith.constant 0 : i32
    %c0_i32_1 = arith.constant 0 : i32
    return %c0_i32, %c0_i32_0 : i32, i32
  }
  func.func @transform_8(%arg0: i32, %arg1: i32) -> (i32, i32) {
    %c0_i32 = arith.constant 0 : i32
    %c0_i32_0 = arith.constant 0 : i32
    %c0_i32_1 = arith.constant 0 : i32
    return %c0_i32, %c0_i32_0 : i32, i32
  }
  func.func @transform_9(%arg0: i32, %arg1: i32) -> (i32, i32) {
    %c0_i32 = arith.constant 0 : i32
    %c0_i32_0 = arith.constant 0 : i32
    %c0_i32_1 = arith.constant 0 : i32
    return %c0_i32, %c0_i32_0 : i32, i32
  }
  func.func @transform_10(%arg0: i32, %arg1: i32) -> (i32, i32) {
    %c0_i32 = arith.constant 0 : i32
    %c0_i32_0 = arith.constant 0 : i32
    %c0_i32_1 = arith.constant 0 : i32
    return %c0_i32, %c0_i32_0 : i32, i32
  }
  func.func @transform_11(%arg0: i32, %arg1: i32) -> (i32, i32) {
    %c0_i32 = arith.constant 0 : i32
    %c0_i32_0 = arith.constant 0 : i32
    %c0_i32_1 = arith.constant 0 : i32
    return %c0_i32, %c0_i32_0 : i32, i32
  }
  func.func @transform_12(%arg0: i32, %arg1: i32) -> (i32, i32) {
    %c0_i32 = arith.constant 0 : i32
    %c0_i32_0 = arith.constant 0 : i32
    %c0_i32_1 = arith.constant 0 : i32
    return %c0_i32, %c0_i32_0 : i32, i32
  }
  func.func @transform_13(%arg0: i32, %arg1: i32) -> (i32, i32) {
    %c0_i32 = arith.constant 0 : i32
    %c0_i32_0 = arith.constant 0 : i32
    %c0_i32_1 = arith.constant 0 : i32
    return %c0_i32, %c0_i32_0 : i32, i32
  }
  func.func @transform_14(%arg0: i32, %arg1: i32) -> (i32, i32) {
    %c0_i32 = arith.constant 0 : i32
    %c0_i32_0 = arith.constant 0 : i32
    return %arg0, %c0_i32 : i32, i32
  }
}

module attributes {stable_mosaic.version = 11 : i64} {
  func.func @block_final_kernel(%arg0: i32, %arg1: i32, %arg2: memref<16x32xf32, #tpu.memory_space<vmem>>, %arg3: memref<16x32xf32, #tpu.memory_space<vmem>>, %arg4: memref<32x32xbf16, #tpu.memory_space<vmem>>, %arg5: memref<1x32xf32, #tpu.memory_space<vmem>>, %arg6: memref<32x32xbf16, #tpu.memory_space<vmem>>, %arg7: memref<1x32xf32, #tpu.memory_space<vmem>>, %arg8: memref<1x32xf32, #tpu.memory_space<vmem>>, %arg9: memref<1x32xf32, #tpu.memory_space<vmem>>, %arg10: memref<32x128xbf16, #tpu.memory_space<vmem>>, %arg11: memref<1x128xf32, #tpu.memory_space<vmem>>, %arg12: memref<128x32xbf16, #tpu.memory_space<vmem>>, %arg13: memref<1x32xf32, #tpu.memory_space<vmem>>, %arg14: memref<1x32xf32, #tpu.memory_space<vmem>>, %arg15: memref<1x32xf32, #tpu.memory_space<vmem>>, %arg16: memref<1x32xf32, #tpu.memory_space<vmem>>, %arg17: memref<1x32xf32, #tpu.memory_space<vmem>>, %arg18: memref<32x128xbf16, #tpu.memory_space<vmem>>, %arg19: memref<1x128xf32, #tpu.memory_space<vmem>>, %arg20: memref<16x128xf32, #tpu.memory_space<vmem>>, %arg21: memref<16x32xf32, #tpu.memory_space<vmem>>, %arg22: memref<16x1xf32, #tpu.memory_space<vmem>>, %arg23: memref<16x1xf32, #tpu.memory_space<vmem>>, %arg24: memref<16x32xf32, #tpu.memory_space<vmem>>) attributes {dimension_semantics = [#tpu.dimension_semantics<parallel>, #tpu.dimension_semantics<arbitrary>], iteration_bounds = array<i64: 1, 1>, scalar_prefetch = 0 : i64, scratch_operands = 4 : i64, tpu.core_type = #tpu.core_type<tc>, window_params = [{transform_indices = @transform_0, window_bounds = array<i64: 16, 32>}, {transform_indices = @transform_1, window_bounds = array<i64: 16, 32>}, {pipeline_mode = #tpu.pipeline_mode<synchronous>, transform_indices = @transform_2, window_bounds = array<i64: 32, 32>}, {pipeline_mode = #tpu.pipeline_mode<synchronous>, transform_indices = @transform_3, window_bounds = array<i64: 1, 32>}, {pipeline_mode = #tpu.pipeline_mode<synchronous>, transform_indices = @transform_4, window_bounds = array<i64: 32, 32>}, {pipeline_mode = #tpu.pipeline_mode<synchronous>, transform_indices = @transform_5, window_bounds = array<i64: 1, 32>}, {pipeline_mode = #tpu.pipeline_mode<synchronous>, transform_indices = @transform_6, window_bounds = array<i64: 1, 32>}, {pipeline_mode = #tpu.pipeline_mode<synchronous>, transform_indices = @transform_7, window_bounds = array<i64: 1, 32>}, {pipeline_mode = #tpu.pipeline_mode<synchronous>, transform_indices = @transform_8, window_bounds = array<i64: 32, 128>}, {pipeline_mode = #tpu.pipeline_mode<synchronous>, transform_indices = @transform_9, window_bounds = array<i64: 1, 128>}, {pipeline_mode = #tpu.pipeline_mode<synchronous>, transform_indices = @transform_10, window_bounds = array<i64: 128, 32>}, {pipeline_mode = #tpu.pipeline_mode<synchronous>, transform_indices = @transform_11, window_bounds = array<i64: 1, 32>}, {pipeline_mode = #tpu.pipeline_mode<synchronous>, transform_indices = @transform_12, window_bounds = array<i64: 1, 32>}, {pipeline_mode = #tpu.pipeline_mode<synchronous>, transform_indices = @transform_13, window_bounds = array<i64: 1, 32>}, {pipeline_mode = #tpu.pipeline_mode<synchronous>, transform_indices = @transform_14, window_bounds = array<i64: 1, 32>}, {pipeline_mode = #tpu.pipeline_mode<synchronous>, transform_indices = @transform_15, window_bounds = array<i64: 1, 32>}, {pipeline_mode = #tpu.pipeline_mode<synchronous>, transform_indices = @transform_16, window_bounds = array<i64: 32, 128>}, {pipeline_mode = #tpu.pipeline_mode<synchronous>, transform_indices = @transform_17, window_bounds = array<i64: 1, 128>}, {transform_indices = @transform_18, window_bounds = array<i64: 16, 128>}]} {
    %c0 = arith.constant 0 : index
    %c0_0 = arith.constant 0 : index
    %0 = vector.load %arg2[%c0, %c0_0] : memref<16x32xf32, #tpu.memory_space<vmem>>, vector<16x32xf32>
    %c0_i32 = arith.constant 0 : i32
    %1 = arith.cmpi eq, %arg1, %c0_i32 : i32
    %2 = arith.extui %1 : i1 to i32
    %c0_i32_1 = arith.constant 0 : i32
    %3 = arith.cmpi ne, %2, %c0_i32_1 : i32
    scf.if %3 {
      %38 = arith.truncf %0 : vector<16x32xf32> to vector<16x32xbf16>
      %c0_26 = arith.constant 0 : index
      %c0_27 = arith.constant 0 : index
      %39 = vector.load %arg4[%c0_26, %c0_27] : memref<32x32xbf16, #tpu.memory_space<vmem>>, vector<32x32xbf16>
      %cst_28 = arith.constant dense<0.000000e+00> : vector<16x32xf32>
      %40 = tpu.matmul %38, %39, %cst_28 {dimension_numbers = #tpu.dot_dimension_numbers<[1], [0], [0], [1], [0, 0, 1, 1], [], []>} : vector<16x32xbf16>, vector<32x32xbf16>, vector<16x32xf32> -> vector<16x32xf32>
      %c0_29 = arith.constant 0 : index
      %c0_30 = arith.constant 0 : index
      %41 = vector.load %arg5[%c0_29, %c0_30] : memref<1x32xf32, #tpu.memory_space<vmem>>, vector<1x32xf32>
      %42 = vector.broadcast %41 : vector<1x32xf32> to vector<16x32xf32>
      %43 = arith.addf %40, %42 : vector<16x32xf32>
      %c0_31 = arith.constant 0 : index
      %c0_32 = arith.constant 0 : index
      %44 = vector.load %arg21[%c0_31, %c0_32] : memref<16x32xf32, #tpu.memory_space<vmem>>, vector<16x32xf32>
      tpu.vector_store %arg21[%c0_31, %c0_32], %43 {strides = array<i32>} : memref<16x32xf32, #tpu.memory_space<vmem>>, vector<16x32xf32>,
      %cst_33 = arith.constant 0xFF800000 : f32
      %45 = vector.broadcast %cst_33 : f32 to vector<16x1xf32>
      %c0_34 = arith.constant 0 : index
      %c0_35 = arith.constant 0 : index
      %46 = vector.load %arg22[%c0_34, %c0_35] : memref<16x1xf32, #tpu.memory_space<vmem>>, vector<16x1xf32>
      tpu.vector_store %arg22[%c0_34, %c0_35], %45 {strides = array<i32>} : memref<16x1xf32, #tpu.memory_space<vmem>>, vector<16x1xf32>,
      %cst_36 = arith.constant 0.000000e+00 : f32
      %47 = vector.broadcast %cst_36 : f32 to vector<16x1xf32>
      %c0_37 = arith.constant 0 : index
      %c0_38 = arith.constant 0 : index
      %48 = vector.load %arg23[%c0_37, %c0_38] : memref<16x1xf32, #tpu.memory_space<vmem>>, vector<16x1xf32>
      tpu.vector_store %arg23[%c0_37, %c0_38], %47 {strides = array<i32>} : memref<16x1xf32, #tpu.memory_space<vmem>>, vector<16x1xf32>,
      %cst_39 = arith.constant 0.000000e+00 : f32
      %49 = vector.broadcast %cst_39 : f32 to vector<16x32xf32>
      %c0_40 = arith.constant 0 : index
      %c0_41 = arith.constant 0 : index
      %50 = vector.load %arg24[%c0_40, %c0_41] : memref<16x32xf32, #tpu.memory_space<vmem>>, vector<16x32xf32>
      tpu.vector_store %arg24[%c0_40, %c0_41], %49 {strides = array<i32>} : memref<16x32xf32, #tpu.memory_space<vmem>>, vector<16x32xf32>,
    } else {
    }
    %c0_2 = arith.constant 0 : index
    %c0_3 = arith.constant 0 : index
    %4 = vector.load %arg3[%c0_2, %c0_3] : memref<16x32xf32, #tpu.memory_space<vmem>>, vector<16x32xf32>
    %5 = arith.truncf %4 : vector<16x32xf32> to vector<16x32xbf16>
    %c0_4 = arith.constant 0 : index
    %c0_5 = arith.constant 0 : index
    %6 = vector.load %arg21[%c0_4, %c0_5] : memref<16x32xf32, #tpu.memory_space<vmem>>, vector<16x32xf32>
    %7 = arith.truncf %6 : vector<16x32xf32> to vector<16x32xbf16>
    %cst = arith.constant dense<0.000000e+00> : vector<16x16xf32>
    %8 = tpu.matmul %7, %5, %cst {dimension_numbers = #tpu.dot_dimension_numbers<[1], [1], [0], [0], [0, 0, 1, 0], [], []>} : vector<16x32xbf16>, vector<16x32xbf16>, vector<16x16xf32> -> vector<16x16xf32>
    %c0_6 = arith.constant 0 : index
    %c0_7 = arith.constant 0 : index
    %9 = vector.load %arg22[%c0_6, %c0_7] : memref<16x1xf32, #tpu.memory_space<vmem>>, vector<16x1xf32>
    %cst_8 = arith.constant dense<0xFF800000> : vector<16xf32>
    %10 = vector.multi_reduction <maximumf>, %8, %cst_8 [1] : vector<16x16xf32> to vector<16xf32>
    %11 = vector.shape_cast %10 : vector<16xf32> to vector<16x1xf32>
    %12 = arith.maximumf %9, %11 : vector<16x1xf32>
    %13 = arith.subf %9, %12 : vector<16x1xf32>
    %14 = math.exp %13 : vector<16x1xf32>
    %15 = vector.broadcast %12 : vector<16x1xf32> to vector<16x16xf32>
    %16 = arith.subf %8, %15 : vector<16x16xf32>
    %17 = math.exp %16 : vector<16x16xf32>
    %c0_9 = arith.constant 0 : index
    %c0_10 = arith.constant 0 : index
    %18 = vector.load %arg23[%c0_9, %c0_10] : memref<16x1xf32, #tpu.memory_space<vmem>>, vector<16x1xf32>
    %19 = arith.mulf %14, %18 : vector<16x1xf32>
    %cst_11 = arith.constant dense<0.000000e+00> : vector<16xf32>
    %20 = vector.multi_reduction <add>, %17, %cst_11 [1] : vector<16x16xf32> to vector<16xf32>
    %21 = vector.shape_cast %20 : vector<16xf32> to vector<16x1xf32>
    %22 = arith.addf %19, %21 : vector<16x1xf32>
    %c0_12 = arith.constant 0 : index
    %c0_13 = arith.constant 0 : index
    %23 = vector.load %arg23[%c0_12, %c0_13] : memref<16x1xf32, #tpu.memory_space<vmem>>, vector<16x1xf32>
    tpu.vector_store %arg23[%c0_12, %c0_13], %22 {strides = array<i32>} : memref<16x1xf32, #tpu.memory_space<vmem>>, vector<16x1xf32>,
    %c0_14 = arith.constant 0 : index
    %c0_15 = arith.constant 0 : index
    %24 = vector.load %arg6[%c0_14, %c0_15] : memref<32x32xbf16, #tpu.memory_space<vmem>>, vector<32x32xbf16>
    %cst_16 = arith.constant dense<0.000000e+00> : vector<16x32xf32>
    %25 = tpu.matmul %5, %24, %cst_16 {dimension_numbers = #tpu.dot_dimension_numbers<[1], [0], [0], [1], [0, 0, 1, 1], [], []>} : vector<16x32xbf16>, vector<32x32xbf16>, vector<16x32xf32> -> vector<16x32xf32>
    %c0_17 = arith.constant 0 : index
    %c0_18 = arith.constant 0 : index
    %26 = vector.load %arg24[%c0_17, %c0_18] : memref<16x32xf32, #tpu.memory_space<vmem>>, vector<16x32xf32>
    %27 = vector.broadcast %14 : vector<16x1xf32> to vector<16x32xf32>
    %28 = arith.mulf %27, %26 : vector<16x32xf32>
    %29 = arith.truncf %17 : vector<16x16xf32> to vector<16x16xbf16>
    %30 = arith.truncf %25 : vector<16x32xf32> to vector<16x32xbf16>
    %cst_19 = arith.constant dense<0.000000e+00> : vector<16x32xf32>
    %31 = tpu.matmul %29, %30, %cst_19 {dimension_numbers = #tpu.dot_dimension_numbers<[1], [0], [0], [1], [0, 0, 1, 1], [], []>} : vector<16x16xbf16>, vector<16x32xbf16>, vector<16x32xf32> -> vector<16x32xf32>
    %32 = arith.addf %28, %31 : vector<16x32xf32>
    %c0_20 = arith.constant 0 : index
    %c0_21 = arith.constant 0 : index
    %33 = vector.load %arg24[%c0_20, %c0_21] : memref<16x32xf32, #tpu.memory_space<vmem>>, vector<16x32xf32>
    tpu.vector_store %arg24[%c0_20, %c0_21], %32 {strides = array<i32>} : memref<16x32xf32, #tpu.memory_space<vmem>>, vector<16x32xf32>,
    %c0_22 = arith.constant 0 : index
    %c0_23 = arith.constant 0 : index
    %34 = vector.load %arg22[%c0_22, %c0_23] : memref<16x1xf32, #tpu.memory_space<vmem>>, vector<16x1xf32>
    tpu.vector_store %arg22[%c0_22, %c0_23], %12 {strides = array<i32>} : memref<16x1xf32, #tpu.memory_space<vmem>>, vector<16x1xf32>,
    %c0_i32_24 = arith.constant 0 : i32
    %35 = arith.cmpi eq, %arg1, %c0_i32_24 : i32
    %36 = arith.extui %35 : i1 to i32
    %c0_i32_25 = arith.constant 0 : i32
    %37 = arith.cmpi ne, %36, %c0_i32_25 : i32
    scf.if %37 {
      %c0_26 = arith.constant 0 : index
      %c0_27 = arith.constant 0 : index
      %38 = vector.load %arg7[%c0_26, %c0_27] : memref<1x32xf32, #tpu.memory_space<vmem>>, vector<1x32xf32>
      %c0_28 = arith.constant 0 : index
      %c0_29 = arith.constant 0 : index
      %39 = vector.load %arg8[%c0_28, %c0_29] : memref<1x32xf32, #tpu.memory_space<vmem>>, vector<1x32xf32>
      %c0_30 = arith.constant 0 : index
      %c0_31 = arith.constant 0 : index
      %40 = vector.load %arg9[%c0_30, %c0_31] : memref<1x32xf32, #tpu.memory_space<vmem>>, vector<1x32xf32>
      %c0_32 = arith.constant 0 : index
      %c0_33 = arith.constant 0 : index
      %41 = vector.load %arg10[%c0_32, %c0_33] : memref<32x128xbf16, #tpu.memory_space<vmem>>, vector<32x128xbf16>
      %c0_34 = arith.constant 0 : index
      %c0_35 = arith.constant 0 : index
      %42 = vector.load %arg11[%c0_34, %c0_35] : memref<1x128xf32, #tpu.memory_space<vmem>>, vector<1x128xf32>
      %c0_36 = arith.constant 0 : index
      %c0_37 = arith.constant 0 : index
      %43 = vector.load %arg12[%c0_36, %c0_37] : memref<128x32xbf16, #tpu.memory_space<vmem>>, vector<128x32xbf16>
      %c0_38 = arith.constant 0 : index
      %c0_39 = arith.constant 0 : index
      %44 = vector.load %arg13[%c0_38, %c0_39] : memref<1x32xf32, #tpu.memory_space<vmem>>, vector<1x32xf32>
      %c0_40 = arith.constant 0 : index
      %c0_41 = arith.constant 0 : index
      %45 = vector.load %arg14[%c0_40, %c0_41] : memref<1x32xf32, #tpu.memory_space<vmem>>, vector<1x32xf32>
      %c0_42 = arith.constant 0 : index
      %c0_43 = arith.constant 0 : index
      %46 = vector.load %arg15[%c0_42, %c0_43] : memref<1x32xf32, #tpu.memory_space<vmem>>, vector<1x32xf32>
      %c0_44 = arith.constant 0 : index
      %c0_45 = arith.constant 0 : index
      %47 = vector.load %arg24[%c0_44, %c0_45] : memref<16x32xf32, #tpu.memory_space<vmem>>, vector<16x32xf32>
      %c0_46 = arith.constant 0 : index
      %c0_47 = arith.constant 0 : index
      %48 = vector.load %arg23[%c0_46, %c0_47] : memref<16x1xf32, #tpu.memory_space<vmem>>, vector<16x1xf32>
      %49 = tpu.reciprocal %48 {approx = true} : vector<16x1xf32> -> vector<16x1xf32>
      %50 = vector.broadcast %49 : vector<16x1xf32> to vector<16x32xf32>
      %51 = arith.mulf %47, %50 : vector<16x32xf32>
      %52 = vector.broadcast %38 : vector<1x32xf32> to vector<16x32xf32>
      %53 = arith.addf %51, %52 : vector<16x32xf32>
      %cst_48 = arith.constant dense<0.000000e+00> : vector<16xf32>
      %54 = vector.multi_reduction <add>, %53, %cst_48 [1] : vector<16x32xf32> to vector<16xf32>
      %55 = vector.shape_cast %54 : vector<16xf32> to vector<16x1xf32>
      %cst_49 = arith.constant 3.200000e+01 : f32
      %56 = vector.broadcast %cst_49 : f32 to vector<16x1xf32>
      %57 = arith.divf %55, %56 : vector<16x1xf32>
      %58 = vector.broadcast %57 : vector<16x1xf32> to vector<16x32xf32>
      %59 = arith.subf %53, %58 : vector<16x32xf32>
      %60 = arith.mulf %59, %59 : vector<16x32xf32>
      %cst_50 = arith.constant dense<0.000000e+00> : vector<16xf32>
      %61 = vector.multi_reduction <add>, %60, %cst_50 [1] : vector<16x32xf32> to vector<16xf32>
      %62 = vector.shape_cast %61 : vector<16xf32> to vector<16x1xf32>
      %cst_51 = arith.constant 3.200000e+01 : f32
      %63 = vector.broadcast %cst_51 : f32 to vector<16x1xf32>
      %64 = arith.divf %62, %63 : vector<16x1xf32>
      %65 = vector.broadcast %57 : vector<16x1xf32> to vector<16x32xf32>
      %66 = arith.subf %53, %65 : vector<16x32xf32>
      %cst_52 = arith.constant 9.99999974E-6 : f32
      %67 = vector.broadcast %cst_52 : f32 to vector<16x1xf32>
      %68 = arith.addf %64, %67 : vector<16x1xf32>
      %69 = math.rsqrt %68 : vector<16x1xf32>
      %70 = vector.broadcast %69 : vector<16x1xf32> to vector<16x32xf32>
      %71 = arith.mulf %66, %70 : vector<16x32xf32>
      %72 = vector.broadcast %39 : vector<1x32xf32> to vector<16x32xf32>
      %73 = arith.mulf %71, %72 : vector<16x32xf32>
      %74 = vector.broadcast %40 : vector<1x32xf32> to vector<16x32xf32>
      %75 = arith.addf %73, %74 : vector<16x32xf32>
      %76 = arith.addf %0, %75 : vector<16x32xf32>
      %77 = arith.truncf %76 : vector<16x32xf32> to vector<16x32xbf16>
      %cst_53 = arith.constant dense<0.000000e+00> : vector<16x128xf32>
      %78 = tpu.matmul %77, %41, %cst_53 {dimension_numbers = #tpu.dot_dimension_numbers<[1], [0], [0], [1], [0, 0, 1, 1], [], []>} : vector<16x32xbf16>, vector<32x128xbf16>, vector<16x128xf32> -> vector<16x128xf32>
      %79 = vector.broadcast %42 : vector<1x128xf32> to vector<16x128xf32>
      %80 = arith.addf %78, %79 : vector<16x128xf32>
      %cst_54 = arith.constant 0.000000e+00 : f32
      %81 = vector.broadcast %cst_54 : f32 to vector<16x128xf32>
      %82 = arith.maximumf %80, %81 : vector<16x128xf32>
      %83 = arith.truncf %82 : vector<16x128xf32> to vector<16x128xbf16>
      %cst_55 = arith.constant dense<0.000000e+00> : vector<16x32xf32>
      %84 = tpu.matmul %83, %43, %cst_55 {dimension_numbers = #tpu.dot_dimension_numbers<[1], [0], [0], [1], [0, 0, 1, 1], [], []>} : vector<16x128xbf16>, vector<128x32xbf16>, vector<16x32xf32> -> vector<16x32xf32>
      %85 = vector.broadcast %44 : vector<1x32xf32> to vector<16x32xf32>
      %86 = arith.addf %84, %85 : vector<16x32xf32>
      %cst_56 = arith.constant dense<0.000000e+00> : vector<16xf32>
      %87 = vector.multi_reduction <add>, %86, %cst_56 [1] : vector<16x32xf32> to vector<16xf32>
      %88 = vector.shape_cast %87 : vector<16xf32> to vector<16x1xf32>
      %cst_57 = arith.constant 3.200000e+01 : f32
      %89 = vector.broadcast %cst_57 : f32 to vector<16x1xf32>
      %90 = arith.divf %88, %89 : vector<16x1xf32>
      %91 = vector.broadcast %90 : vector<16x1xf32> to vector<16x32xf32>
      %92 = arith.subf %86, %91 : vector<16x32xf32>
      %93 = arith.mulf %92, %92 : vector<16x32xf32>
      %cst_58 = arith.constant dense<0.000000e+00> : vector<16xf32>
      %94 = vector.multi_reduction <add>, %93, %cst_58 [1] : vector<16x32xf32> to vector<16xf32>
      %95 = vector.shape_cast %94 : vector<16xf32> to vector<16x1xf32>
      %cst_59 = arith.constant 3.200000e+01 : f32
      %96 = vector.broadcast %cst_59 : f32 to vector<16x1xf32>
      %97 = arith.divf %95, %96 : vector<16x1xf32>
      %98 = vector.broadcast %90 : vector<16x1xf32> to vector<16x32xf32>
      %99 = arith.subf %86, %98 : vector<16x32xf32>
      %cst_60 = arith.constant 9.99999974E-6 : f32
      %100 = vector.broadcast %cst_60 : f32 to vector<16x1xf32>
      %101 = arith.addf %97, %100 : vector<16x1xf32>
      %102 = math.rsqrt %101 : vector<16x1xf32>
      %103 = vector.broadcast %102 : vector<16x1xf32> to vector<16x32xf32>
      %104 = arith.mulf %99, %103 : vector<16x32xf32>
      %105 = vector.broadcast %45 : vector<1x32xf32> to vector<16x32xf32>
      %106 = arith.mulf %104, %105 : vector<16x32xf32>
      %107 = vector.broadcast %46 : vector<1x32xf32> to vector<16x32xf32>
      %108 = arith.addf %106, %107 : vector<16x32xf32>
      %109 = arith.addf %76, %108 : vector<16x32xf32>
      %c0_61 = arith.constant 0 : index
      %c0_62 = arith.constant 0 : index
      %110 = vector.load %arg16[%c0_61, %c0_62] : memref<1x32xf32, #tpu.memory_space<vmem>>, vector<1x32xf32>
      %c0_63 = arith.constant 0 : index
      %c0_64 = arith.constant 0 : index
      %111 = vector.load %arg17[%c0_63, %c0_64] : memref<1x32xf32, #tpu.memory_space<vmem>>, vector<1x32xf32>
      %cst_65 = arith.constant dense<0.000000e+00> : vector<16xf32>
      %112 = vector.multi_reduction <add>, %109, %cst_65 [1] : vector<16x32xf32> to vector<16xf32>
      %113 = vector.shape_cast %112 : vector<16xf32> to vector<16x1xf32>
      %cst_66 = arith.constant 3.200000e+01 : f32
      %114 = vector.broadcast %cst_66 : f32 to vector<16x1xf32>
      %115 = arith.divf %113, %114 : vector<16x1xf32>
      %116 = vector.broadcast %115 : vector<16x1xf32> to vector<16x32xf32>
      %117 = arith.subf %109, %116 : vector<16x32xf32>
      %118 = arith.mulf %117, %117 : vector<16x32xf32>
      %cst_67 = arith.constant dense<0.000000e+00> : vector<16xf32>
      %119 = vector.multi_reduction <add>, %118, %cst_67 [1] : vector<16x32xf32> to vector<16xf32>
      %120 = vector.shape_cast %119 : vector<16xf32> to vector<16x1xf32>
      %cst_68 = arith.constant 3.200000e+01 : f32
      %121 = vector.broadcast %cst_68 : f32 to vector<16x1xf32>
      %122 = arith.divf %120, %121 : vector<16x1xf32>
      %123 = vector.broadcast %115 : vector<16x1xf32> to vector<16x32xf32>
      %124 = arith.subf %109, %123 : vector<16x32xf32>
      %cst_69 = arith.constant 9.99999974E-6 : f32
      %125 = vector.broadcast %cst_69 : f32 to vector<16x1xf32>
      %126 = arith.addf %122, %125 : vector<16x1xf32>
      %127 = math.rsqrt %126 : vector<16x1xf32>
      %128 = vector.broadcast %127 : vector<16x1xf32> to vector<16x32xf32>
      %129 = arith.mulf %124, %128 : vector<16x32xf32>
      %130 = vector.broadcast %110 : vector<1x32xf32> to vector<16x32xf32>
      %131 = arith.mulf %129, %130 : vector<16x32xf32>
      %132 = vector.broadcast %111 : vector<1x32xf32> to vector<16x32xf32>
      %133 = arith.addf %131, %132 : vector<16x32xf32>
      %134 = arith.truncf %133 : vector<16x32xf32> to vector<16x32xbf16>
      %c0_70 = arith.constant 0 : index
      %c0_71 = arith.constant 0 : index
      %135 = vector.load %arg18[%c0_70, %c0_71] : memref<32x128xbf16, #tpu.memory_space<vmem>>, vector<32x128xbf16>
      %cst_72 = arith.constant dense<0.000000e+00> : vector<16x128xf32>
      %136 = tpu.matmul %134, %135, %cst_72 {dimension_numbers = #tpu.dot_dimension_numbers<[1], [0], [0], [1], [0, 0, 1, 1], [], []>} : vector<16x32xbf16>, vector<32x128xbf16>, vector<16x128xf32> -> vector<16x128xf32>
      %c0_73 = arith.constant 0 : index
      %c0_74 = arith.constant 0 : index
      %137 = vector.load %arg19[%c0_73, %c0_74] : memref<1x128xf32, #tpu.memory_space<vmem>>, vector<1x128xf32>
      %138 = vector.broadcast %137 : vector<1x128xf32> to vector<16x128xf32>
      %139 = arith.addf %136, %138 : vector<16x128xf32>
      %c0_75 = arith.constant 0 : index
      %c0_76 = arith.constant 0 : index
      %140 = vector.load %arg20[%c0_75, %c0_76] : memref<16x128xf32, #tpu.memory_space<vmem>>, vector<16x128xf32>
      tpu.vector_store %arg20[%c0_75, %c0_76], %139 {strides = array<i32>} : memref<16x128xf32, #tpu.memory_space<vmem>>, vector<16x128xf32>,
    } else {
    }
    return
  }
  func.func @transform_0(%arg0: i32, %arg1: i32) -> (i32, i32) {
    %c0_i32 = arith.constant 0 : i32
    %c0_i32_0 = arith.constant 0 : i32
    return %arg0, %c0_i32 : i32, i32
  }
  func.func @transform_1(%arg0: i32, %arg1: i32) -> (i32, i32) {
    %c0_i32 = arith.constant 0 : i32
    %c0_i32_0 = arith.constant 0 : i32
    return %arg1, %c0_i32 : i32, i32
  }
  func.func @transform_2(%arg0: i32, %arg1: i32) -> (i32, i32) {
    %c0_i32 = arith.constant 0 : i32
    %c0_i32_0 = arith.constant 0 : i32
    %c0_i32_1 = arith.constant 0 : i32
    return %c0_i32, %c0_i32_0 : i32, i32
  }
  func.func @transform_3(%arg0: i32, %arg1: i32) -> (i32, i32) {
    %c0_i32 = arith.constant 0 : i32
    %c0_i32_0 = arith.constant 0 : i32
    %c0_i32_1 = arith.constant 0 : i32
    return %c0_i32, %c0_i32_0 : i32, i32
  }
  func.func @transform_4(%arg0: i32, %arg1: i32) -> (i32, i32) {
    %c0_i32 = arith.constant 0 : i32
    %c0_i32_0 = arith.constant 0 : i32
    %c0_i32_1 = arith.constant 0 : i32
    return %c0_i32, %c0_i32_0 : i32, i32
  }
  func.func @transform_5(%arg0: i32, %arg1: i32) -> (i32, i32) {
    %c0_i32 = arith.constant 0 : i32
    %c0_i32_0 = arith.constant 0 : i32
    %c0_i32_1 = arith.constant 0 : i32
    return %c0_i32, %c0_i32_0 : i32, i32
  }
  func.func @transform_6(%arg0: i32, %arg1: i32) -> (i32, i32) {
    %c0_i32 = arith.constant 0 : i32
    %c0_i32_0 = arith.constant 0 : i32
    %c0_i32_1 = arith.constant 0 : i32
    return %c0_i32, %c0_i32_0 : i32, i32
  }
  func.func @transform_7(%arg0: i32, %arg1: i32) -> (i32, i32) {
    %c0_i32 = arith.constant 0 : i32
    %c0_i32_0 = arith.constant 0 : i32
    %c0_i32_1 = arith.constant 0 : i32
    return %c0_i32, %c0_i32_0 : i32, i32
  }
  func.func @transform_8(%arg0: i32, %arg1: i32) -> (i32, i32) {
    %c0_i32 = arith.constant 0 : i32
    %c0_i32_0 = arith.constant 0 : i32
    %c0_i32_1 = arith.constant 0 : i32
    return %c0_i32, %c0_i32_0 : i32, i32
  }
  func.func @transform_9(%arg0: i32, %arg1: i32) -> (i32, i32) {
    %c0_i32 = arith.constant 0 : i32
    %c0_i32_0 = arith.constant 0 : i32
    %c0_i32_1 = arith.constant 0 : i32
    return %c0_i32, %c0_i32_0 : i32, i32
  }
  func.func @transform_10(%arg0: i32, %arg1: i32) -> (i32, i32) {
    %c0_i32 = arith.constant 0 : i32
    %c0_i32_0 = arith.constant 0 : i32
    %c0_i32_1 = arith.constant 0 : i32
    return %c0_i32, %c0_i32_0 : i32, i32
  }
  func.func @transform_11(%arg0: i32, %arg1: i32) -> (i32, i32) {
    %c0_i32 = arith.constant 0 : i32
    %c0_i32_0 = arith.constant 0 : i32
    %c0_i32_1 = arith.constant 0 : i32
    return %c0_i32, %c0_i32_0 : i32, i32
  }
  func.func @transform_12(%arg0: i32, %arg1: i32) -> (i32, i32) {
    %c0_i32 = arith.constant 0 : i32
    %c0_i32_0 = arith.constant 0 : i32
    %c0_i32_1 = arith.constant 0 : i32
    return %c0_i32, %c0_i32_0 : i32, i32
  }
  func.func @transform_13(%arg0: i32, %arg1: i32) -> (i32, i32) {
    %c0_i32 = arith.constant 0 : i32
    %c0_i32_0 = arith.constant 0 : i32
    %c0_i32_1 = arith.constant 0 : i32
    return %c0_i32, %c0_i32_0 : i32, i32
  }
  func.func @transform_14(%arg0: i32, %arg1: i32) -> (i32, i32) {
    %c0_i32 = arith.constant 0 : i32
    %c0_i32_0 = arith.constant 0 : i32
    %c0_i32_1 = arith.constant 0 : i32
    return %c0_i32, %c0_i32_0 : i32, i32
  }
  func.func @transform_15(%arg0: i32, %arg1: i32) -> (i32, i32) {
    %c0_i32 = arith.constant 0 : i32
    %c0_i32_0 = arith.constant 0 : i32
    %c0_i32_1 = arith.constant 0 : i32
    return %c0_i32, %c0_i32_0 : i32, i32
  }
  func.func @transform_16(%arg0: i32, %arg1: i32) -> (i32, i32) {
    %c0_i32 = arith.constant 0 : i32
    %c0_i32_0 = arith.constant 0 : i32
    %c0_i32_1 = arith.constant 0 : i32
    return %c0_i32, %c0_i32_0 : i32, i32
  }
  func.func @transform_17(%arg0: i32, %arg1: i32) -> (i32, i32) {
    %c0_i32 = arith.constant 0 : i32
    %c0_i32_0 = arith.constant 0 : i32
    %c0_i32_1 = arith.constant 0 : i32
    return %c0_i32, %c0_i32_0 : i32, i32
  }
  func.func @transform_18(%arg0: i32, %arg1: i32) -> (i32, i32) {
    %c0_i32 = arith.constant 0 : i32
    %c0_i32_0 = arith.constant 0 : i32
    return %arg0, %c0_i32 : i32, i32
  }
}

</mosaic_0001>

<bundles_post_ra>
// kernel: gpt_forward.3
= control target key start
LH: loop header
LB: loop body
LE: loop exit
PB: predicated region body
PF: predicated region fallthrough
CT: control target
= control target key end

     0   :  { %vm90_vm0 = vcmask 261120   ;;  %v961_v0 = vmov 0.0   ;;  %vm962_vm1 = vmmov 0   ;;  %vm137_vm2 = vcmask 7168   ;;  %s1248_s2 = inlined_call_operand.vmem [shape: bf16[32,32], index: 2, kind: input, shape index: {}]   ;;  %s1249_s0 = inlined_call_operand.vmem [shape: f32[16,32], index: 0, kind: input, shape index: {}, may-alias: {0,1}]   ;;  %s1250_s1 = inlined_call_operand.vmem [shape: f32[16,32], index: 1, kind: input, shape index: {}, may-alias: {0,1}]   ;;  %s1251_s3 = inlined_call_operand.vmem [shape: f32[1,32], index: 3, kind: input, shape index: {}]   ;;  %s1252_s4 = inlined_call_operand.vmem [shape: bf16[32,32], index: 4, kind: input, shape index: {}]   ;;  %s1253_s5 = inlined_call_operand.vmem [shape: f32[1,32], index: 5, kind: input, shape index: {}]   ;;  %s1254_s8 = inlined_call_operand.vmem [shape: bf16[32,128], index: 8, kind: input, shape index: {}]   ;;  %s1255_s10 = inlined_call_operand.vmem [shape: bf16[128,32], index: 10, kind: input, shape index: {}]   ;;  %s1256_s6 = inlined_call_operand.vmem [shape: f32[1,32], index: 6, kind: input, shape index: {}]   ;;  %s1257_s7 = inlined_call_operand.vmem [shape: f32[1,32], index: 7, kind: input, shape index: {}]   ;;  %s1258_s9 = inlined_call_operand.vmem [shape: f32[1,128], index: 9, kind: input, shape index: {}]   ;;  %s1259_s11 = inlined_call_operand.vmem [shape: f32[1,32], index: 11, kind: input, shape index: {}]   ;;  %s1260_s12 = inlined_call_operand.vmem [shape: f32[1,32], index: 12, kind: input, shape index: {}]   ;;  %s1261_s13 = inlined_call_operand.vmem [shape: f32[1,32], index: 13, kind: input, shape index: {}]   ;;  %s1262_s16 = inlined_call_operand.vmem [shape: bf16[32,128], index: 16, kind: input, shape index: {}]   ;;  %s1263_s14 = inlined_call_operand.vmem [shape: f32[1,32], index: 14, kind: input, shape index: {}]   ;;  %s1264_s15 = inlined_call_operand.vmem [shape: f32[1,32], index: 15, kind: input, shape index: {}]   ;;  %s1265_s17 = inlined_call_operand.vmem [shape: f32[1,128], index: 17, kind: input, shape index: {}]   ;;  %s1266_s18 = inlined_call_operand.vmem [shape: f32[16,128], index: 18, kind: output, shape index: {}]  }
   0x1   :  { %1270 = sst [smem:[#allocation6_spill]] %s1248_s2  ;;  %851 = vmatprep.subr.bf16.mxu0 %v961_v0  ;;  %855 = vmatprep.mubr.msk.bf16.mxu0 %vm962_vm1, %v961_v0  ;;  %142 = vst.msk [vmem:[#allocation5] sm:$0xff] %vm90_vm0, %v961_v0  ;;  %143 = vst.msk [vmem:[#allocation5 + $0x8] sm:$0xff] %vm90_vm0, %v961_v0  ;;  %v793_v10 = vld [vmem:[%s1251_s3] ss:$0 sm:$0xff]  ;;  %v963_v21 = vmov -inf  }
   0x2   :  { %1271 = sst [smem:[#allocation7_spill]] %s1249_s0  ;;  %s1273_s29 = sld [smem:[#allocation6_spill]]  ;;  %873 = vmatprep.subr.bf16.mxu1 %v961_v0  ;;  %875 = vmatprep.mubr.msk.bf16.mxu1 %vm962_vm1, %v961_v0  ;;  %v923_v20 = vld [vmem:[%s1252_s4] sm:$0xff]   ;;  %138 = vst.msk [vmem:[#allocation3] sm:$0xff] %vm137_vm2, %v963_v21  ;;  %139 = vst.msk [vmem:[#allocation3 + $0x8] sm:$0xff] %vm137_vm2, %v963_v21  ;;  %v924_v22 = vld [vmem:[%s1252_s4 + $0x8] sm:$0xff]  }
   0x3   :  { %1272 = sst [smem:[#allocation8_spill]] %s1250_s1  ;;  %s1274_s20 = sld [smem:[#allocation7_spill]]  ;;  %140 = vst.msk [vmem:[#allocation4] sm:$0xff] %vm137_vm2, %v961_v0  ;;  %141 = vst.msk [vmem:[#allocation4 + $0x8] sm:$0xff] %vm137_vm2, %v961_v0  ;;  %vm200_vm3 = vcmask 130048   ;;  %v964_v29 = vmov 0  }
   0x4   :  { %s1275_s24 = sld [smem:[#allocation8_spill]]  ;;  %919 = vset.pattern.permute.xlu1 %v964_v29  ;;  %920 = vset.pattern.permute.xlu0 %v964_v29 }
   0x8   :  { %v921_v1 = vld [vmem:[%s1273_s29] sm:$0xff]   ;;  %v922_v2 = vld [vmem:[%s1273_s29 + $0x8] sm:$0xff]  }
   0x9   :  { %852 = vmatpush3.bf16.msra.mxu0 %v921_v1  ;;  %v1079_v3 = vld [vmem:[%s1274_s20] sm:$0xff]  ;;  %v1084_v4 = vld [vmem:[%s1274_s20 + $0x8] sm:$0xff]  ;;  %v198_v30 = vld [vmem:[#allocation3] sm:$0xff] }
   0xa   :  { %853 = vmatprep.subr.bf16.mxu0 %v961_v0  ;;  %v66_v5 = vpack.c.bf16 %v1084_v4, %v1079_v3  ;;  %v144_v6 = vld [vmem:[%s1275_s24] sm:$0xff]  ;;  %v145_v7 = vld [vmem:[%s1275_s24 + $0x8] sm:$0xff]  ;;  %v199_v33 = vld [vmem:[#allocation3 + $0x8] sm:$0xff] }
   0xb   :  { %v146_v8 = vpack.c.bf16 %v145_v7, %v144_v6  ;;  %v231_v58 = vld [vmem:[#allocation4] sm:$0xff]  ;;  %v232_v61 = vld [vmem:[#allocation4 + $0x8] sm:$0xff] }
   0xd   :  { %854 = vmatpush3.bf16.msra.mxu0 %v922_v2  ;;  %v155_v9 = vsel %vm90_vm0, %v146_v8, 0 }
   0xe   :  { %859 = vmatprep.subr.bf16.mxu0 %v961_v0 }
  0x10   :  { %856 = vmatmul.mubr.msk.bf16.vlgmr.msra.gmra.mrb[0].mxu0 %vm90_vm0, %v66_v5 }
  0x11   :  { %861 = vmatprep.mubr.msk.bf16.mxu0 %vm962_vm1, %v961_v0 }
  0x16   :  { %860 = vmatpush3.bf16.xpose.msra.mxu0 %v155_v9  ;;  %v303_v9 = vld [vmem:[#allocation5] sm:$0xff] }
  0x17   :  { %865 = vmatprep.subr.bf16.mxu0 %v961_v0 }
  0xe3   :  { %v128_v11 = vpop.f32.mrb[0].mxu0 }
  0xe4   :  { %v129_v12 = vadd.f32 %v793_v10, %v128_v11  ;;  %v857_v13 = vpop.f32.mrb[1].mxu0  ;;  %v304_v11 = vld [vmem:[#allocation5 + $0x8] sm:$0xff] }
  0xe5   :  { %v131_v14 = vpop.f32.mrb[2].mxu0 }
  0xe6   :  { %135 = vst.msk [vmem:[#allocation2] sm:$0xff] %vm90_vm0, %v129_v12  ;;  %v132_v15 = vadd.f32 %v793_v10, %v131_v14  ;;  %v858_v16 = vpop.f32.mrb[3].mxu0 }
  0xe8   :  { %136 = vst.msk [vmem:[#allocation2 + $0x8] sm:$0xff] %vm90_vm0, %v132_v15 }
  0xed   :  { %v147_v17 = vld [vmem:[#allocation2] sm:$0xff] }
  0xef   :  { %v148_v18 = vld [vmem:[#allocation2 + $0x8] sm:$0xff] }
  0xf0   :  { %v149_v19 = vpack.c.bf16 %v148_v18, %v147_v17 }
  0xf2   :  { %862 = vmatmul.mubr.msk.bf16.vlgmr.msra.gmra.mrb[4].mxu0 %vm90_vm0, %v149_v19 }
  0xf3   :  { %869 = vmatprep.mubr.msk.bf16.mxu0 %vm962_vm1, %v961_v0  ;;  %866 = vmatpush3.bf16.msra.mxu0 %v923_v20 }
  0xf4   :  { %867 = vmatprep.subr.bf16.mxu0 %v961_v0 }
  0xf7   :  { %868 = vmatpush3.bf16.msra.mxu0 %v924_v22 }
  0xf8   :  { %879 = vmatprep.subr.bf16.mxu0 %v961_v0 }
  0xfa   :  { %870 = vmatmul.mubr.msk.bf16.vlgmr.msra.gmra.mrb[8].mxu0 %vm90_vm0, %v146_v8 }
  0xfb   :  { %883 = vmatprep.mubr.msk.bf16.mxu0 %vm962_vm1, %v961_v0 }
 0x1c5   :  { %v191_v23 = vpop.f32.mrb[4].mxu0 }
 0x1c6   :  { %v863_v24 = vpop.f32.mrb[5].mxu0  ;;  %v201_v25 = vsel %vm200_vm3, %v191_v23, -inf }
 0x1c7   :  { %202 = vmax.xlane.f32.xlu0 %v201_v25  ;;  %v194_v26 = vpop.f32.mrb[6].mxu0 }
 0x1c8   :  { %v864_v27 = vpop.f32.mrb[7].mxu0  ;;  %v204_v28 = vsel %vm200_vm3, %v194_v26, -inf }
 0x1cb   :  { %205 = vmax.xlane.f32.xlu0 %v204_v28 }
 0x1cd   :  { %v296_v38 = vpop.f32.mrb[8].mxu0 }
 0x1ce   :  { %v871_v39 = vpop.f32.mrb[9].mxu0 }
 0x1cf   :  { %v299_v40 = vpop.f32.mrb[10].mxu0 }
 0x1d0   :  { %v318_v41 = vpack.c.bf16 %v299_v40, %v296_v38  ;;  %v872_v42 = vpop.f32.mrb[11].mxu0 }
 0x1d1   :  { %v925_v42 = vld [vmem:[%s1254_s8] sm:$0xff]  }
 0x1d2   :  { %874 = vmatpush3.bf16.msra.mxu1 %v318_v41  ;;  %880 = vmatpush3.bf16.msra.mxu0 %v925_v42 }
 0x1d3   :  { %887 = vmatprep.subr.bf16.mxu1 %v961_v0  ;;  %881 = vmatprep.subr.bf16.mxu0 %v961_v0 }
 0x254   :  { %v203_v31 = vpop.xlane.xlu0 %202 }
 0x255   :  { %v207_v32 = vmax.f32 %v198_v30, %v203_v31 }
 0x257   :  { %v209_v34 = vsub.f32 %v198_v30, %v207_v32  ;;  %367 = vst.msk [vmem:[#allocation3] sm:$0xff] %vm137_vm2, %v207_v32  ;;  %217 = vperm.xlu1 %919, %v207_v32  }
 0x258   :  { %v206_v35 = vpop.xlane.xlu0 %205 }
 0x259   :  { %v208_v36 = vmax.f32 %v199_v33, %v206_v35  ;;  %v211_v55 = vmul.f32 1.442695, %v209_v34 }
 0x25b   :  { %v210_v37 = vsub.f32 %v199_v33, %v208_v36  ;;  %368 = vst.msk [vmem:[#allocation3 + $0x8] sm:$0xff] %vm137_vm2, %v208_v36  ;;  %222 = vperm.xlu1 %919, %v208_v36  }
 0x25d   :  { %v213_v54 = vmul.f32 1.442695, %v210_v37 }
 0x2d6   :  { %v218_v43 = vpop.permute.xlu1 %217 }
 0x2d7   :  { %v225_v44 = vsub.f32 %v191_v23, %v218_v43  ;;  %v802_v23 = vld [vmem:[%s1253_s5] ss:$0 sm:$0xff]  ;;  %v926_v43 = vld [vmem:[%s1254_s8 + $0x8] sm:$0xff]  }
 0x2d8   :  { %882 = vmatpush3.bf16.msra.mxu0 %v926_v43 }
 0x2d9   :  { %v227_v45 = vmul.f32 1.442695, %v225_v44  ;;  %907 = vmatprep.subr.bf16.mxu0 %v961_v0  ;;  %v927_v44 = vld [vmem:[%s1255_s10] sm:$0xff]  }
 0x2da   :  { %v223_v46 = vpop.permute.xlu1 %222 }
 0x2db   :  { %937 = vpow2.f32 %v227_v45  ;;  %v226_v47 = vsub.f32 %v194_v26, %v223_v46  ;;  %v928_v45 = vld [vmem:[%s1255_s10 + $0x8] sm:$0xff]   ;;  %v929_v46 = vld [vmem:[%s1255_s10 + $0x10] sm:$0xff]  }
 0x2dd   :  { %v229_v48 = vmul.f32 1.442695, %v226_v47  ;;  %v930_v47 = vld [vmem:[%s1255_s10 + $0x18] sm:$0xff]  }
 0x2df   :  { %939 = vpow2.f32 %v229_v48  ;;  %v931_v48 = vld [vmem:[%s1255_s10 + $0x20] sm:$0xff]  }
 0x2e0   :  { %941 = vpow2.f32 %v213_v54 }
 0x2e1   :  { %943 = vpow2.f32 %v211_v55 }
 0x2e5   :  { %v938_v49 = vpop.eup %937 }
 0x2e6   :  { %v235_v50 = vsel %vm200_vm3, %v938_v49, 0.0 }
 0x2e7   :  { %236 = vadd.xlane.f32.xlu0 %v235_v50 }
 0x2e9   :  { %v940_v51 = vpop.eup %939 }
 0x2ea   :  { %v238_v52 = vsel %vm200_vm3, %v940_v51, 0.0  ;;  %v317_v53 = vpack.c.bf16 %v940_v51, %v938_v49  ;;  %v942_v56 = vpop.eup %941  ;;  %v932_v49 = vld [vmem:[%s1255_s10 + $0x28] sm:$0xff]  }
 0x2eb   :  { %239 = vadd.xlane.f32.xlu1 %v238_v52  ;;  %v944_v57 = vpop.eup %943  ;;  %v234_v63 = vmul.f32 %v942_v56, %v232_v61  ;;  %v804_v61 = vld [vmem:[%s1257_s7] ss:$0 sm:$0xff] }
 0x2ec   :  { %876 = vmatmul.mubr.msk.bf16.vlgmr.msra.gmra.mrb[0].mxu1 %vm200_vm3, %v317_v53  ;;  %v233_v59 = vmul.f32 %v944_v57, %v231_v58 }
 0x2ed   :  { %903 = vmatprep.mubr.msk.bf16.mxu1 %vm962_vm1, %v961_v0  ;;  %888 = vmatpush3.bf16.msra.mxu1 %v927_v44  ;;  %v818_v44 = vld [vmem:[%s1260_s12] ss:$0 sm:$0xff] }
 0x2ee   :  { %889 = vmatprep.subr.bf16.mxu1 %v961_v0 }
 0x2f1   :  { %890 = vmatpush3.bf16.msra.mxu1 %v928_v45 }
 0x2f2   :  { %891 = vmatprep.subr.bf16.mxu1 %v961_v0 }
 0x2f5   :  { %892 = vmatpush3.bf16.msra.mxu1 %v929_v46 }
 0x2f6   :  { %893 = vmatprep.subr.bf16.mxu1 %v961_v0 }
 0x2f9   :  { %894 = vmatpush3.bf16.msra.mxu1 %v930_v47  ;;  %v819_v47 = vld [vmem:[%s1261_s13] ss:$0 sm:$0xff] }
 0x2fa   :  { %895 = vmatprep.subr.bf16.mxu1 %v961_v0 }
 0x2fc   :  { %312 = vperm.xlu1 %919, %v942_v56  }
 0x2fd   :  { %307 = vperm.xlu0 %920, %v944_v57   ;;  %896 = vmatpush3.bf16.msra.mxu1 %v931_v48  ;;  %v803_v57 = vld [vmem:[%s1256_s6] ss:$0 sm:$0xff] }
 0x2fe   :  { %897 = vmatprep.subr.bf16.mxu1 %v961_v0 }
 0x301   :  { %898 = vmatpush3.bf16.msra.mxu1 %v932_v49 }
 0x302   :  { %899 = vmatprep.subr.bf16.mxu1 %v961_v0 }
 0x374   :  { %v237_v60 = vpop.xlane.xlu0 %236 }
 0x375   :  { %v241_v62 = vadd.f32 %v237_v60, %v233_v59 }
 0x377   :  { %244 = vst.msk [vmem:[#allocation4] sm:$0xff] %vm137_vm2, %v241_v62 }
 0x378   :  { %v240_v1 = vpop.xlane.xlu1 %239 }
 0x379   :  { %v242_v2 = vadd.f32 %v240_v1, %v234_v63 }
 0x37b   :  { %245 = vst.msk [vmem:[#allocation4 + $0x8] sm:$0xff] %vm137_vm2, %v242_v2 }
 0x37c   :  { %v308_v10 = vpop.permute.xlu0 %307  ;;  %v313_v12 = vpop.permute.xlu1 %312 }
 0x37d   :  { %v315_v13 = vmul.f32 %v308_v10, %v303_v9  ;;  %v316_v15 = vmul.f32 %v313_v12, %v304_v11 }
 0x37e   :  { %v401_v5 = vld [vmem:[#allocation4] sm:$0xff] }
 0x37f   :  { %945 = vrcp.f32 %v401_v5 }
 0x382   :  { %v402_v6 = vld [vmem:[#allocation4 + $0x8] sm:$0xff] }
 0x383   :  { %947 = vrcp.f32 %v402_v6 }
 0x389   :  { %v946_v7 = vpop.eup %945 }
 0x38a   :  { %407 = vperm.xlu0 %920, %v946_v7  }
 0x38d   :  { %v948_v8 = vpop.eup %947 }
 0x38e   :  { %412 = vperm.xlu0 %920, %v948_v8   ;;  %v933_v8 = vld [vmem:[%s1255_s10 + $0x30] sm:$0xff]  }
 0x38f   :  { %900 = vmatpush3.bf16.msra.mxu1 %v933_v8 }
 0x390   :  { %901 = vmatprep.subr.bf16.mxu1 %v961_v0 }
 0x3bf   :  { %v356_v14 = vpop.f32.mrb[0].mxu1 }
 0x3c0   :  { %v363_v16 = vadd.f32 %v356_v14, %v315_v13  ;;  %v877_v17 = vpop.f32.mrb[1].mxu1 }
 0x3c1   :  { %v359_v18 = vpop.f32.mrb[2].mxu1 }
 0x3c2   :  { %365 = vst.msk [vmem:[#allocation5] sm:$0xff] %vm90_vm0, %v363_v16  ;;  %v364_v19 = vadd.f32 %v359_v18, %v316_v15  ;;  %v878_v20 = vpop.f32.mrb[3].mxu1  ;;  %v809_v18 = vld [vmem:[%s1259_s11] ss:$0 sm:$0xff] }
 0x3c4   :  { %366 = vst.msk [vmem:[#allocation5 + $0x8] sm:$0xff] %vm90_vm0, %v364_v19 }
 0x3c9   :  { %v399_v22 = vld [vmem:[#allocation5] sm:$0xff] }
 0x3cb   :  { %v400_v27 = vld [vmem:[#allocation5 + $0x8] sm:$0xff] }
 0x409   :  { %v408_v21 = vpop.permute.xlu0 %407 }
 0x40a   :  { %v415_v24 = vmul.f32 %v408_v21, %v399_v22 }
 0x40c   :  { %v423_v25 = vadd.f32 %v802_v23, %v415_v24 }
 0x40d   :  { %v413_v26 = vpop.permute.xlu0 %412 }
 0x40e   :  { %v416_v28 = vmul.f32 %v413_v26, %v400_v27  ;;  %v425_v29 = vsel %vm90_vm0, %v423_v25, 0.0 }
 0x40f   :  { %426 = vadd.xlane.f32.xlu1 %v425_v29 }
 0x410   :  { %v424_v30 = vadd.f32 %v802_v23, %v416_v28 }
 0x412   :  { %v428_v31 = vsel %vm90_vm0, %v424_v30, 0.0 }
 0x413   :  { %429 = vadd.xlane.f32.xlu0 %v428_v31 }
 0x49c   :  { %v427_v32 = vpop.xlane.xlu1 %426 }
 0x49d   :  { %v432_v33 = vmul.f32 0.03125, %v427_v32 }
 0x49f   :  { %v434_v34 = vsub.f32 %v423_v25, %v432_v33 }
 0x4a0   :  { %v430_v35 = vpop.xlane.xlu0 %429 }
 0x4a1   :  { %v433_v36 = vmul.f32 0.03125, %v430_v35  ;;  %v436_v37 = vmul.f32 %v434_v34, %v434_v34 }
 0x4a3   :  { %v435_v38 = vsub.f32 %v424_v30, %v433_v36  ;;  %v438_v39 = vsel %vm90_vm0, %v436_v37, 0.0 }
 0x4a4   :  { %439 = vadd.xlane.f32.xlu0 %v438_v39 }
 0x4a5   :  { %v437_v40 = vmul.f32 %v435_v38, %v435_v38 }
 0x4a7   :  { %v441_v41 = vsel %vm90_vm0, %v437_v40, 0.0 }
 0x4a8   :  { %442 = vadd.xlane.f32.xlu1 %v441_v41 }
 0x531   :  { %v440_v50 = vpop.xlane.xlu0 %439 }
 0x532   :  { %v444_v51 = vmul.f32 0.03125, %v440_v50 }
 0x534   :  { %v446_v52 = vadd.f32 1e-05, %v444_v51 }
 0x535   :  { %v443_v53 = vpop.xlane.xlu1 %442 }
 0x536   :  { %949 = vrsqrt.f32 %v446_v52  ;;  %v445_v54 = vmul.f32 0.03125, %v443_v53 }
 0x538   :  { %v447_v55 = vadd.f32 1e-05, %v445_v54 }
 0x53a   :  { %951 = vrsqrt.f32 %v447_v55 }
 0x540   :  { %v950_v56 = vpop.eup %949 }
 0x541   :  { %v450_v58 = vmul.f32 %v950_v56, %v434_v34 }
 0x543   :  { %v458_v59 = vmul.f32 %v803_v57, %v450_v58 }
 0x544   :  { %v952_v60 = vpop.eup %951 }
 0x545   :  { %v451_v62 = vmul.f32 %v952_v60, %v435_v38  ;;  %v466_v1 = vadd.f32 %v804_v61, %v458_v59 }
 0x547   :  { %v459_v63 = vmul.f32 %v803_v57, %v451_v62  ;;  %v1186_v5 = vadd.f32 %v466_v1, %v1079_v3  ;;  %v934_v3 = vld [vmem:[%s1255_s10 + $0x38] sm:$0xff]  }
 0x548   :  { %902 = vmatpush3.bf16.msra.mxu1 %v934_v3 }
 0x549   :  { %v467_v2 = vadd.f32 %v804_v61, %v459_v63 }
 0x54b   :  { %v1189_v6 = vadd.f32 %v467_v2, %v1084_v4  ;;  %v805_v4 = vld [vmem:[%s1258_s9] ss:$0 sm:$0xff] }
 0x54d   :  { %v470_v7 = vpack.c.bf16 %v1189_v6, %v1186_v5 }
 0x54f   :  { %884 = vmatmul.mubr.msk.bf16.vlgmr.msra.gmra.mrb[12].mxu0 %vm90_vm0, %v470_v7  ;;  %v936_v7 = vld [vmem:[%s1262_s16 + $0x8] sm:$0xff]  }
 0x550   :  { %911 = vmatprep.mubr.msk.bf16.mxu0 %vm962_vm1, %v961_v0 }
 0x622   :  { %v526_v9 = vpop.f32.mrb[12].mxu0 }
 0x623   :  { %v527_v10 = vadd.f32 %v805_v4, %v526_v9  ;;  %v885_v11 = vpop.f32.mrb[13].mxu0 }
 0x624   :  { %v529_v12 = vpop.f32.mrb[14].mxu0 }
 0x625   :  { %v530_v13 = vadd.f32 %v805_v4, %v529_v12  ;;  %v886_v14 = vpop.f32.mrb[15].mxu0  ;;  %v533_v15 = vmax.f32 %v527_v10, 0.0 }
 0x627   :  { %v534_v16 = vmax.f32 %v530_v13, 0.0  ;;  %v820_v13 = vld [vmem:[%s1263_s14] ss:$0 sm:$0xff] }
 0x629   :  { %v535_v17 = vpack.c.bf16 %v534_v16, %v533_v15 }
 0x62b   :  { %904 = vmatmul.mubr.bf16.vlgmr.msra.gmra.mrb[4].mxu1 %v535_v17  ;;  %v821_v17 = vld [vmem:[%s1264_s15] ss:$0 sm:$0xff] }
 0x6fe   :  { %v624_v19 = vpop.f32.mrb[4].mxu1 }
 0x6ff   :  { %v625_v20 = vadd.f32 %v809_v18, %v624_v19  ;;  %v905_v21 = vpop.f32.mrb[5].mxu1 }
 0x700   :  { %v627_v22 = vpop.f32.mrb[6].mxu1 }
 0x701   :  { %v628_v23 = vadd.f32 %v809_v18, %v627_v22  ;;  %v906_v24 = vpop.f32.mrb[7].mxu1  ;;  %v631_v25 = vsel %vm90_vm0, %v625_v20, 0.0  ;;  %v822_v22 = vld [vmem:[%s1265_s17] ss:$0 sm:$0xff] }
 0x702   :  { %632 = vadd.xlane.f32.xlu0 %v631_v25 }
 0x703   :  { %v634_v26 = vsel %vm90_vm0, %v628_v23, 0.0 }
 0x704   :  { %635 = vadd.xlane.f32.xlu1 %v634_v26 }
 0x78f   :  { %v633_v27 = vpop.xlane.xlu0 %632 }
 0x790   :  { %v637_v28 = vmul.f32 0.03125, %v633_v27 }
 0x791   :  { %v636_v29 = vpop.xlane.xlu1 %635 }
 0x792   :  { %v639_v30 = vsub.f32 %v625_v20, %v637_v28  ;;  %v638_v31 = vmul.f32 0.03125, %v636_v29 }
 0x794   :  { %v640_v32 = vsub.f32 %v628_v23, %v638_v31  ;;  %v641_v33 = vmul.f32 %v639_v30, %v639_v30 }
 0x796   :  { %v643_v34 = vsel %vm90_vm0, %v641_v33, 0.0  ;;  %v642_v35 = vmul.f32 %v640_v32, %v640_v32 }
 0x797   :  { %644 = vadd.xlane.f32.xlu0 %v643_v34 }
 0x798   :  { %v646_v36 = vsel %vm90_vm0, %v642_v35, 0.0 }
 0x799   :  { %647 = vadd.xlane.f32.xlu1 %v646_v36 }
 0x824   :  { %v645_v37 = vpop.xlane.xlu0 %644 }
 0x825   :  { %v649_v38 = vmul.f32 0.03125, %v645_v37 }
 0x826   :  { %v648_v39 = vpop.xlane.xlu1 %647 }
 0x827   :  { %v651_v40 = vadd.f32 1e-05, %v649_v38  ;;  %v650_v41 = vmul.f32 0.03125, %v648_v39 }
 0x829   :  { %953 = vrsqrt.f32 %v651_v40  ;;  %v652_v42 = vadd.f32 1e-05, %v650_v41 }
 0x82b   :  { %955 = vrsqrt.f32 %v652_v42 }
 0x833   :  { %v954_v43 = vpop.eup %953 }
 0x834   :  { %v655_v45 = vmul.f32 %v954_v43, %v639_v30 }
 0x835   :  { %v956_v46 = vpop.eup %955 }
 0x836   :  { %v663_v48 = vmul.f32 %v818_v44, %v655_v45  ;;  %v656_v49 = vmul.f32 %v956_v46, %v640_v32 }
 0x838   :  { %v671_v50 = vadd.f32 %v819_v47, %v663_v48  ;;  %v664_v51 = vmul.f32 %v818_v44, %v656_v49 }
 0x83a   :  { %v673_v52 = vadd.f32 %v671_v50, %v1186_v5  ;;  %v672_v53 = vadd.f32 %v819_v47, %v664_v51 }
 0x83c   :  { %v677_v54 = vsel %vm90_vm0, %v673_v52, 0.0  ;;  %v674_v55 = vadd.f32 %v672_v53, %v1189_v6  ;;  %v935_v6 = vld [vmem:[%s1262_s16] sm:$0xff]  }
 0x83d   :  { %678 = vadd.xlane.f32.xlu0 %v677_v54  ;;  %908 = vmatpush3.bf16.msra.mxu0 %v935_v6 }
 0x83e   :  { %v680_v56 = vsel %vm90_vm0, %v674_v55, 0.0  ;;  %909 = vmatprep.subr.bf16.mxu0 %v961_v0 }
 0x83f   :  { %681 = vadd.xlane.f32.xlu1 %v680_v56 }
 0x841   :  { %910 = vmatpush3.bf16.msra.mxu0 %v936_v7 }
 0x8ca   :  { %v679_v57 = vpop.xlane.xlu0 %678 }
 0x8cb   :  { %v683_v58 = vmul.f32 0.03125, %v679_v57 }
 0x8cc   :  { %v682_v59 = vpop.xlane.xlu1 %681 }
 0x8cd   :  { %v685_v60 = vsub.f32 %v673_v52, %v683_v58  ;;  %v684_v61 = vmul.f32 0.03125, %v682_v59 }
 0x8cf   :  { %v686_v62 = vsub.f32 %v674_v55, %v684_v61  ;;  %v687_v63 = vmul.f32 %v685_v60, %v685_v60 }
 0x8d1   :  { %v689_v1 = vsel %vm90_vm0, %v687_v63, 0.0  ;;  %v688_v2 = vmul.f32 %v686_v62, %v686_v62 }
 0x8d2   :  { %690 = vadd.xlane.f32.xlu0 %v689_v1 }
 0x8d3   :  { %v692_v5 = vsel %vm90_vm0, %v688_v2, 0.0 }
 0x8d4   :  { %693 = vadd.xlane.f32.xlu1 %v692_v5 }
 0x95f   :  { %v691_v8 = vpop.xlane.xlu0 %690 }
 0x960   :  { %v695_v3 = vmul.f32 0.03125, %v691_v8 }
 0x961   :  { %v694_v4 = vpop.xlane.xlu1 %693 }
 0x962   :  { %v697_v9 = vadd.f32 1e-05, %v695_v3  ;;  %v696_v10 = vmul.f32 0.03125, %v694_v4 }
 0x964   :  { %957 = vrsqrt.f32 %v697_v9  ;;  %v698_v11 = vadd.f32 1e-05, %v696_v10 }
 0x966   :  { %959 = vrsqrt.f32 %v698_v11 }
 0x96e   :  { %v958_v12 = vpop.eup %957 }
 0x96f   :  { %v701_v14 = vmul.f32 %v958_v12, %v685_v60 }
 0x970   :  { %v960_v0 = vpop.eup %959 }
 0x971   :  { %v709_v15 = vmul.f32 %v820_v13, %v701_v14  ;;  %v702_v16 = vmul.f32 %v960_v0, %v686_v62 }
 0x973   :  { %v710_v18 = vmul.f32 %v820_v13, %v702_v16  ;;  %v717_v19 = vadd.f32 %v821_v17, %v709_v15 }
 0x975   :  { %v718_v20 = vadd.f32 %v821_v17, %v710_v18 }
 0x977   :  { %v719_v21 = vpack.c.bf16 %v718_v20, %v717_v19 }
 0x979   :  { %912 = vmatmul.mubr.msk.bf16.vlgmr.msra.gmra.mrb[16].mxu0 %vm90_vm0, %v719_v21 }
 0xa4c   :  { %v780_v23 = vpop.f32.mrb[16].mxu0 }
 0xa4d   :  { %v781_v24 = vadd.f32 %v822_v22, %v780_v23  ;;  %v913_v25 = vpop.f32.mrb[17].mxu0 }
 0xa4e   :  { %v783_v26 = vpop.f32.mrb[18].mxu0 }
 0xa4f   :  { %787 = vst [vmem:[%s1266_s18] sm:$0xff] %v781_v24  ;;  %v784_v27 = vadd.f32 %v822_v22, %v783_v26  ;;  %v914_v28 = vpop.f32.mrb[19].mxu0 }
 0xa51   :  { %788 = vst [vmem:[%s1266_s18 + $0x8] sm:$0xff] %v784_v27 }

// kernel: gpt_forward.2
= control target key start
LH: loop header
LB: loop body
LE: loop exit
PB: predicated region body
PF: predicated region fallthrough
CT: control target
= control target key end

     0   :  { %vm78_vm0 = vcmask 261120   ;;  %v814_v0 = vmov 0.0   ;;  %vm815_vm1 = vmmov 0   ;;  %vm125_vm2 = vcmask 7168   ;;  %s1059_s2 = inlined_call_operand.vmem [shape: bf16[32,32], index: 2, kind: input, shape index: {}]   ;;  %s1060_s0 = inlined_call_operand.vmem [shape: f32[16,32], index: 0, kind: input, shape index: {}, may-alias: {0,1}]   ;;  %s1061_s1 = inlined_call_operand.vmem [shape: f32[16,32], index: 1, kind: input, shape index: {}, may-alias: {0,1}]   ;;  %s1062_s3 = inlined_call_operand.vmem [shape: f32[1,32], index: 3, kind: input, shape index: {}]   ;;  %s1063_s4 = inlined_call_operand.vmem [shape: bf16[32,32], index: 4, kind: input, shape index: {}]   ;;  %s1064_s5 = inlined_call_operand.vmem [shape: f32[1,32], index: 5, kind: input, shape index: {}]   ;;  %s1065_s8 = inlined_call_operand.vmem [shape: bf16[32,128], index: 8, kind: input, shape index: {}]   ;;  %s1066_s10 = inlined_call_operand.vmem [shape: bf16[128,32], index: 10, kind: input, shape index: {}]   ;;  %s1067_s6 = inlined_call_operand.vmem [shape: f32[1,32], index: 6, kind: input, shape index: {}]   ;;  %s1068_s7 = inlined_call_operand.vmem [shape: f32[1,32], index: 7, kind: input, shape index: {}]   ;;  %s1069_s9 = inlined_call_operand.vmem [shape: f32[1,128], index: 9, kind: input, shape index: {}]   ;;  %s1070_s11 = inlined_call_operand.vmem [shape: f32[1,32], index: 11, kind: input, shape index: {}]   ;;  %s1071_s12 = inlined_call_operand.vmem [shape: f32[1,32], index: 12, kind: input, shape index: {}]   ;;  %s1072_s13 = inlined_call_operand.vmem [shape: f32[1,32], index: 13, kind: input, shape index: {}]   ;;  %s1073_s14 = inlined_call_operand.vmem [shape: f32[16,32], index: 14, kind: output, shape index: {}]  }
   0x1   :  { %718 = vmatprep.subr.bf16.mxu0 %v814_v0  ;;  %v780_v1 = vld [vmem:[%s1059_s2] sm:$0xff]   ;;  %722 = vmatprep.mubr.msk.bf16.mxu0 %vm815_vm1, %v814_v0  ;;  %130 = vst.msk [vmem:[#allocation5] sm:$0xff] %vm78_vm0, %v814_v0  ;;  %131 = vst.msk [vmem:[#allocation5 + $0x8] sm:$0xff] %vm78_vm0, %v814_v0  ;;  %v781_v2 = vld [vmem:[%s1059_s2 + $0x8] sm:$0xff]   ;;  %v816_v21 = vmov -inf   ;;  %vm188_vm3 = vcmask 130048  }
   0x2   :  { %740 = vmatprep.subr.bf16.mxu1 %v814_v0  ;;  %742 = vmatprep.mubr.msk.bf16.mxu1 %vm815_vm1, %v814_v0  ;;  %v912_v3 = vld [vmem:[%s1060_s0] sm:$0xff]  ;;  %v917_v4 = vld [vmem:[%s1060_s0 + $0x8] sm:$0xff]  ;;  %126 = vst.msk [vmem:[#allocation3] sm:$0xff] %vm125_vm2, %v816_v21  ;;  %127 = vst.msk [vmem:[#allocation3 + $0x8] sm:$0xff] %vm125_vm2, %v816_v21  ;;  %v817_v29 = vmov 0  }
   0x3   :  { %719 = vmatpush3.bf16.msra.mxu0 %v780_v1  ;;  %v54_v5 = vpack.c.bf16 %v917_v4, %v912_v3  ;;  %v132_v6 = vld [vmem:[%s1061_s1] sm:$0xff]  ;;  %v133_v7 = vld [vmem:[%s1061_s1 + $0x8] sm:$0xff]  ;;  %128 = vst.msk [vmem:[#allocation4] sm:$0xff] %vm125_vm2, %v814_v0  ;;  %129 = vst.msk [vmem:[#allocation4 + $0x8] sm:$0xff] %vm125_vm2, %v814_v0  ;;  %778 = vset.pattern.permute.xlu1 %v817_v29 }
   0x4   :  { %720 = vmatprep.subr.bf16.mxu0 %v814_v0  ;;  %v134_v8 = vpack.c.bf16 %v133_v7, %v132_v6  ;;  %v669_v10 = vld [vmem:[%s1062_s3] ss:$0 sm:$0xff]  ;;  %v783_v22 = vld [vmem:[%s1063_s4 + $0x8] sm:$0xff]   ;;  %779 = vset.pattern.permute.xlu0 %v817_v29 }
   0x5   :  { %v782_v20 = vld [vmem:[%s1063_s4] sm:$0xff]  }
   0x6   :  { %v143_v9 = vsel %vm78_vm0, %v134_v8, 0 }
   0x7   :  { %721 = vmatpush3.bf16.msra.mxu0 %v781_v2 }
   0x8   :  { %726 = vmatprep.subr.bf16.mxu0 %v814_v0 }
   0x9   :  { %v186_v30 = vld [vmem:[#allocation3] sm:$0xff]  ;;  %v187_v33 = vld [vmem:[#allocation3 + $0x8] sm:$0xff] }
   0xa   :  { %723 = vmatmul.mubr.msk.bf16.vlgmr.msra.gmra.mrb[0].mxu0 %vm78_vm0, %v54_v5  ;;  %v219_v58 = vld [vmem:[#allocation4] sm:$0xff]  ;;  %v220_v61 = vld [vmem:[#allocation4 + $0x8] sm:$0xff] }
   0xb   :  { %728 = vmatprep.mubr.msk.bf16.mxu0 %vm815_vm1, %v814_v0 }
  0x10   :  { %727 = vmatpush3.bf16.xpose.msra.mxu0 %v143_v9  ;;  %v291_v9 = vld [vmem:[#allocation5] sm:$0xff] }
  0x11   :  { %732 = vmatprep.subr.bf16.mxu0 %v814_v0 }
  0xdd   :  { %v116_v11 = vpop.f32.mrb[0].mxu0 }
  0xde   :  { %v117_v12 = vadd.f32 %v669_v10, %v116_v11  ;;  %v724_v13 = vpop.f32.mrb[1].mxu0  ;;  %v292_v11 = vld [vmem:[#allocation5 + $0x8] sm:$0xff] }
  0xdf   :  { %v119_v14 = vpop.f32.mrb[2].mxu0 }
  0xe0   :  { %123 = vst.msk [vmem:[#allocation2] sm:$0xff] %vm78_vm0, %v117_v12  ;;  %v120_v15 = vadd.f32 %v669_v10, %v119_v14  ;;  %v725_v16 = vpop.f32.mrb[3].mxu0 }
  0xe2   :  { %124 = vst.msk [vmem:[#allocation2 + $0x8] sm:$0xff] %vm78_vm0, %v120_v15 }
  0xe7   :  { %v135_v17 = vld [vmem:[#allocation2] sm:$0xff] }
  0xe9   :  { %v136_v18 = vld [vmem:[#allocation2 + $0x8] sm:$0xff] }
  0xea   :  { %v137_v19 = vpack.c.bf16 %v136_v18, %v135_v17 }
  0xec   :  { %729 = vmatmul.mubr.msk.bf16.vlgmr.msra.gmra.mrb[4].mxu0 %vm78_vm0, %v137_v19 }
  0xed   :  { %736 = vmatprep.mubr.msk.bf16.mxu0 %vm815_vm1, %v814_v0  ;;  %733 = vmatpush3.bf16.msra.mxu0 %v782_v20 }
  0xee   :  { %734 = vmatprep.subr.bf16.mxu0 %v814_v0 }
  0xf1   :  { %735 = vmatpush3.bf16.msra.mxu0 %v783_v22 }
  0xf2   :  { %746 = vmatprep.subr.bf16.mxu0 %v814_v0 }
  0xf4   :  { %737 = vmatmul.mubr.msk.bf16.vlgmr.msra.gmra.mrb[8].mxu0 %vm78_vm0, %v134_v8 }
  0xf5   :  { %750 = vmatprep.mubr.msk.bf16.mxu0 %vm815_vm1, %v814_v0 }
 0x1bf   :  { %v179_v23 = vpop.f32.mrb[4].mxu0 }
 0x1c0   :  { %v730_v24 = vpop.f32.mrb[5].mxu0  ;;  %v189_v25 = vsel %vm188_vm3, %v179_v23, -inf }
 0x1c1   :  { %190 = vmax.xlane.f32.xlu0 %v189_v25  ;;  %v182_v26 = vpop.f32.mrb[6].mxu0 }
 0x1c2   :  { %v731_v27 = vpop.f32.mrb[7].mxu0  ;;  %v192_v28 = vsel %vm188_vm3, %v182_v26, -inf }
 0x1c5   :  { %193 = vmax.xlane.f32.xlu0 %v192_v28 }
 0x1c7   :  { %v284_v38 = vpop.f32.mrb[8].mxu0 }
 0x1c8   :  { %v738_v39 = vpop.f32.mrb[9].mxu0 }
 0x1c9   :  { %v287_v40 = vpop.f32.mrb[10].mxu0 }
 0x1ca   :  { %v306_v41 = vpack.c.bf16 %v287_v40, %v284_v38  ;;  %v739_v42 = vpop.f32.mrb[11].mxu0 }
 0x1cb   :  { %v784_v42 = vld [vmem:[%s1065_s8] sm:$0xff]  }
 0x1cc   :  { %741 = vmatpush3.bf16.msra.mxu1 %v306_v41  ;;  %747 = vmatpush3.bf16.msra.mxu0 %v784_v42 }
 0x1cd   :  { %754 = vmatprep.subr.bf16.mxu1 %v814_v0  ;;  %748 = vmatprep.subr.bf16.mxu0 %v814_v0 }
 0x24e   :  { %v191_v31 = vpop.xlane.xlu0 %190 }
 0x24f   :  { %v195_v32 = vmax.f32 %v186_v30, %v191_v31 }
 0x251   :  { %v197_v34 = vsub.f32 %v186_v30, %v195_v32  ;;  %355 = vst.msk [vmem:[#allocation3] sm:$0xff] %vm125_vm2, %v195_v32  ;;  %205 = vperm.xlu1 %778, %v195_v32  }
 0x252   :  { %v194_v35 = vpop.xlane.xlu0 %193 }
 0x253   :  { %v196_v36 = vmax.f32 %v187_v33, %v194_v35  ;;  %v199_v55 = vmul.f32 1.442695, %v197_v34 }
 0x255   :  { %v198_v37 = vsub.f32 %v187_v33, %v196_v36  ;;  %356 = vst.msk [vmem:[#allocation3 + $0x8] sm:$0xff] %vm125_vm2, %v196_v36  ;;  %210 = vperm.xlu1 %778, %v196_v36  }
 0x257   :  { %v201_v54 = vmul.f32 1.442695, %v198_v37 }
 0x2d0   :  { %v206_v43 = vpop.permute.xlu1 %205 }
 0x2d1   :  { %v213_v44 = vsub.f32 %v179_v23, %v206_v43  ;;  %v678_v23 = vld [vmem:[%s1064_s5] ss:$0 sm:$0xff]  ;;  %v785_v43 = vld [vmem:[%s1065_s8 + $0x8] sm:$0xff]  }
 0x2d2   :  { %749 = vmatpush3.bf16.msra.mxu0 %v785_v43  ;;  %v694_v43 = vld [vmem:[%s1071_s12] ss:$0 sm:$0xff] }
 0x2d3   :  { %v215_v45 = vmul.f32 1.442695, %v213_v44  ;;  %v786_v44 = vld [vmem:[%s1066_s10] sm:$0xff]  }
 0x2d4   :  { %v211_v46 = vpop.permute.xlu1 %210 }
 0x2d5   :  { %794 = vpow2.f32 %v215_v45  ;;  %v214_v47 = vsub.f32 %v182_v26, %v211_v46  ;;  %v787_v45 = vld [vmem:[%s1066_s10 + $0x8] sm:$0xff]   ;;  %v788_v46 = vld [vmem:[%s1066_s10 + $0x10] sm:$0xff]  }
 0x2d7   :  { %v217_v48 = vmul.f32 1.442695, %v214_v47  ;;  %v789_v47 = vld [vmem:[%s1066_s10 + $0x18] sm:$0xff]  }
 0x2d9   :  { %796 = vpow2.f32 %v217_v48  ;;  %v790_v48 = vld [vmem:[%s1066_s10 + $0x20] sm:$0xff]  }
 0x2da   :  { %798 = vpow2.f32 %v201_v54 }
 0x2db   :  { %800 = vpow2.f32 %v199_v55 }
 0x2df   :  { %v795_v49 = vpop.eup %794 }
 0x2e0   :  { %v223_v50 = vsel %vm188_vm3, %v795_v49, 0.0 }
 0x2e1   :  { %224 = vadd.xlane.f32.xlu0 %v223_v50 }
 0x2e3   :  { %v797_v51 = vpop.eup %796 }
 0x2e4   :  { %v226_v52 = vsel %vm188_vm3, %v797_v51, 0.0  ;;  %v305_v53 = vpack.c.bf16 %v797_v51, %v795_v49  ;;  %v799_v56 = vpop.eup %798  ;;  %v791_v49 = vld [vmem:[%s1066_s10 + $0x28] sm:$0xff]  }
 0x2e5   :  { %227 = vadd.xlane.f32.xlu1 %v226_v52  ;;  %v801_v57 = vpop.eup %800  ;;  %v222_v63 = vmul.f32 %v799_v56, %v220_v61  ;;  %v680_v61 = vld [vmem:[%s1068_s7] ss:$0 sm:$0xff] }
 0x2e6   :  { %743 = vmatmul.mubr.msk.bf16.vlgmr.msra.gmra.mrb[0].mxu1 %vm188_vm3, %v305_v53  ;;  %v221_v59 = vmul.f32 %v801_v57, %v219_v58 }
 0x2e7   :  { %770 = vmatprep.mubr.msk.bf16.mxu1 %vm815_vm1, %v814_v0  ;;  %755 = vmatpush3.bf16.msra.mxu1 %v786_v44 }
 0x2e8   :  { %756 = vmatprep.subr.bf16.mxu1 %v814_v0 }
 0x2eb   :  { %757 = vmatpush3.bf16.msra.mxu1 %v787_v45 }
 0x2ec   :  { %758 = vmatprep.subr.bf16.mxu1 %v814_v0 }
 0x2ef   :  { %759 = vmatpush3.bf16.msra.mxu1 %v788_v46  ;;  %v695_v46 = vld [vmem:[%s1072_s13] ss:$0 sm:$0xff] }
 0x2f0   :  { %760 = vmatprep.subr.bf16.mxu1 %v814_v0 }
 0x2f3   :  { %761 = vmatpush3.bf16.msra.mxu1 %v789_v47 }
 0x2f4   :  { %762 = vmatprep.subr.bf16.mxu1 %v814_v0 }
 0x2f6   :  { %300 = vperm.xlu1 %778, %v799_v56  }
 0x2f7   :  { %295 = vperm.xlu0 %779, %v801_v57   ;;  %763 = vmatpush3.bf16.msra.mxu1 %v790_v48  ;;  %v679_v57 = vld [vmem:[%s1067_s6] ss:$0 sm:$0xff] }
 0x2f8   :  { %764 = vmatprep.subr.bf16.mxu1 %v814_v0 }
 0x2fb   :  { %765 = vmatpush3.bf16.msra.mxu1 %v791_v49 }
 0x2fc   :  { %766 = vmatprep.subr.bf16.mxu1 %v814_v0 }
 0x36e   :  { %v225_v60 = vpop.xlane.xlu0 %224 }
 0x36f   :  { %v229_v62 = vadd.f32 %v225_v60, %v221_v59 }
 0x371   :  { %232 = vst.msk [vmem:[#allocation4] sm:$0xff] %vm125_vm2, %v229_v62 }
 0x372   :  { %v228_v1 = vpop.xlane.xlu1 %227 }
 0x373   :  { %v230_v2 = vadd.f32 %v228_v1, %v222_v63 }
 0x375   :  { %233 = vst.msk [vmem:[#allocation4 + $0x8] sm:$0xff] %vm125_vm2, %v230_v2 }
 0x376   :  { %v296_v10 = vpop.permute.xlu0 %295  ;;  %v301_v12 = vpop.permute.xlu1 %300 }
 0x377   :  { %v303_v13 = vmul.f32 %v296_v10, %v291_v9  ;;  %v304_v15 = vmul.f32 %v301_v12, %v292_v11 }
 0x378   :  { %v389_v5 = vld [vmem:[#allocation4] sm:$0xff] }
 0x379   :  { %802 = vrcp.f32 %v389_v5 }
 0x37c   :  { %v390_v6 = vld [vmem:[#allocation4 + $0x8] sm:$0xff] }
 0x37d   :  { %804 = vrcp.f32 %v390_v6 }
 0x383   :  { %v803_v7 = vpop.eup %802 }
 0x384   :  { %395 = vperm.xlu0 %779, %v803_v7  }
 0x387   :  { %v805_v8 = vpop.eup %804 }
 0x388   :  { %400 = vperm.xlu0 %779, %v805_v8   ;;  %v792_v8 = vld [vmem:[%s1066_s10 + $0x30] sm:$0xff]  }
 0x389   :  { %767 = vmatpush3.bf16.msra.mxu1 %v792_v8 }
 0x38a   :  { %768 = vmatprep.subr.bf16.mxu1 %v814_v0  ;;  %v685_v0 = vld [vmem:[%s1070_s11] ss:$0 sm:$0xff] }
 0x3b9   :  { %v344_v14 = vpop.f32.mrb[0].mxu1 }
 0x3ba   :  { %v351_v16 = vadd.f32 %v344_v14, %v303_v13  ;;  %v744_v17 = vpop.f32.mrb[1].mxu1 }
 0x3bb   :  { %v347_v18 = vpop.f32.mrb[2].mxu1 }
 0x3bc   :  { %353 = vst.msk [vmem:[#allocation5] sm:$0xff] %vm78_vm0, %v351_v16  ;;  %v352_v19 = vadd.f32 %v347_v18, %v304_v15  ;;  %v745_v20 = vpop.f32.mrb[3].mxu1 }
 0x3be   :  { %354 = vst.msk [vmem:[#allocation5 + $0x8] sm:$0xff] %vm78_vm0, %v352_v19 }
 0x3c3   :  { %v387_v22 = vld [vmem:[#allocation5] sm:$0xff] }
 0x3c5   :  { %v388_v27 = vld [vmem:[#allocation5 + $0x8] sm:$0xff] }
 0x403   :  { %v396_v21 = vpop.permute.xlu0 %395 }
 0x404   :  { %v403_v24 = vmul.f32 %v396_v21, %v387_v22 }
 0x406   :  { %v411_v25 = vadd.f32 %v678_v23, %v403_v24 }
 0x407   :  { %v401_v26 = vpop.permute.xlu0 %400 }
 0x408   :  { %v404_v28 = vmul.f32 %v401_v26, %v388_v27  ;;  %v413_v29 = vsel %vm78_vm0, %v411_v25, 0.0 }
 0x409   :  { %414 = vadd.xlane.f32.xlu1 %v413_v29 }
 0x40a   :  { %v412_v30 = vadd.f32 %v678_v23, %v404_v28 }
 0x40c   :  { %v416_v31 = vsel %vm78_vm0, %v412_v30, 0.0 }
 0x40d   :  { %417 = vadd.xlane.f32.xlu0 %v416_v31 }
 0x496   :  { %v415_v32 = vpop.xlane.xlu1 %414 }
 0x497   :  { %v420_v33 = vmul.f32 0.03125, %v415_v32 }
 0x499   :  { %v422_v34 = vsub.f32 %v411_v25, %v420_v33 }
 0x49a   :  { %v418_v35 = vpop.xlane.xlu0 %417 }
 0x49b   :  { %v421_v36 = vmul.f32 0.03125, %v418_v35  ;;  %v424_v37 = vmul.f32 %v422_v34, %v422_v34 }
 0x49d   :  { %v423_v38 = vsub.f32 %v412_v30, %v421_v36  ;;  %v426_v39 = vsel %vm78_vm0, %v424_v37, 0.0 }
 0x49e   :  { %427 = vadd.xlane.f32.xlu0 %v426_v39 }
 0x49f   :  { %v425_v40 = vmul.f32 %v423_v38, %v423_v38 }
 0x4a1   :  { %v429_v41 = vsel %vm78_vm0, %v425_v40, 0.0 }
 0x4a2   :  { %430 = vadd.xlane.f32.xlu1 %v429_v41 }
 0x52b   :  { %v428_v50 = vpop.xlane.xlu0 %427 }
 0x52c   :  { %v432_v51 = vmul.f32 0.03125, %v428_v50 }
 0x52e   :  { %v434_v52 = vadd.f32 1e-05, %v432_v51 }
 0x52f   :  { %v431_v53 = vpop.xlane.xlu1 %430 }
 0x530   :  { %806 = vrsqrt.f32 %v434_v52  ;;  %v433_v54 = vmul.f32 0.03125, %v431_v53 }
 0x532   :  { %v435_v55 = vadd.f32 1e-05, %v433_v54 }
 0x534   :  { %808 = vrsqrt.f32 %v435_v55 }
 0x53a   :  { %v807_v56 = vpop.eup %806 }
 0x53b   :  { %v438_v58 = vmul.f32 %v807_v56, %v422_v34 }
 0x53d   :  { %v446_v59 = vmul.f32 %v679_v57, %v438_v58 }
 0x53e   :  { %v809_v60 = vpop.eup %808 }
 0x53f   :  { %v439_v62 = vmul.f32 %v809_v60, %v423_v38  ;;  %v454_v1 = vadd.f32 %v680_v61, %v446_v59 }
 0x541   :  { %v447_v63 = vmul.f32 %v679_v57, %v439_v62  ;;  %v1018_v5 = vadd.f32 %v454_v1, %v912_v3  ;;  %v793_v3 = vld [vmem:[%s1066_s10 + $0x38] sm:$0xff]  }
 0x542   :  { %769 = vmatpush3.bf16.msra.mxu1 %v793_v3 }
 0x543   :  { %v455_v2 = vadd.f32 %v680_v61, %v447_v63 }
 0x545   :  { %v1021_v6 = vadd.f32 %v455_v2, %v917_v4  ;;  %v681_v4 = vld [vmem:[%s1069_s9] ss:$0 sm:$0xff] }
 0x547   :  { %v458_v7 = vpack.c.bf16 %v1021_v6, %v1018_v5 }
 0x549   :  { %751 = vmatmul.mubr.msk.bf16.vlgmr.msra.gmra.mrb[12].mxu0 %vm78_vm0, %v458_v7 }
 0x61c   :  { %v514_v9 = vpop.f32.mrb[12].mxu0 }
 0x61d   :  { %v515_v10 = vadd.f32 %v681_v4, %v514_v9  ;;  %v752_v11 = vpop.f32.mrb[13].mxu0 }
 0x61e   :  { %v517_v12 = vpop.f32.mrb[14].mxu0 }
 0x61f   :  { %v518_v13 = vadd.f32 %v681_v4, %v517_v12  ;;  %v753_v14 = vpop.f32.mrb[15].mxu0  ;;  %v521_v15 = vmax.f32 %v515_v10, 0.0 }
 0x621   :  { %v522_v16 = vmax.f32 %v518_v13, 0.0 }
 0x623   :  { %v523_v17 = vpack.c.bf16 %v522_v16, %v521_v15 }
 0x625   :  { %771 = vmatmul.mubr.bf16.vlgmr.msra.gmra.mrb[4].mxu1 %v523_v17 }
 0x6f8   :  { %v612_v18 = vpop.f32.mrb[4].mxu1 }
 0x6f9   :  { %v613_v19 = vadd.f32 %v685_v0, %v612_v18  ;;  %v772_v20 = vpop.f32.mrb[5].mxu1 }
 0x6fa   :  { %v615_v21 = vpop.f32.mrb[6].mxu1 }
 0x6fb   :  { %v616_v22 = vadd.f32 %v685_v0, %v615_v21  ;;  %v773_v23 = vpop.f32.mrb[7].mxu1  ;;  %v619_v24 = vsel %vm78_vm0, %v613_v19, 0.0 }
 0x6fc   :  { %620 = vadd.xlane.f32.xlu0 %v619_v24 }
 0x6fd   :  { %v622_v25 = vsel %vm78_vm0, %v616_v22, 0.0 }
 0x6fe   :  { %623 = vadd.xlane.f32.xlu1 %v622_v25 }
 0x789   :  { %v621_v26 = vpop.xlane.xlu0 %620 }
 0x78a   :  { %v625_v27 = vmul.f32 0.03125, %v621_v26 }
 0x78b   :  { %v624_v28 = vpop.xlane.xlu1 %623 }
 0x78c   :  { %v627_v29 = vsub.f32 %v613_v19, %v625_v27  ;;  %v626_v30 = vmul.f32 0.03125, %v624_v28 }
 0x78e   :  { %v628_v31 = vsub.f32 %v616_v22, %v626_v30  ;;  %v629_v32 = vmul.f32 %v627_v29, %v627_v29 }
 0x790   :  { %v631_v33 = vsel %vm78_vm0, %v629_v32, 0.0  ;;  %v630_v34 = vmul.f32 %v628_v31, %v628_v31 }
 0x791   :  { %632 = vadd.xlane.f32.xlu0 %v631_v33 }
 0x792   :  { %v634_v35 = vsel %vm78_vm0, %v630_v34, 0.0 }
 0x793   :  { %635 = vadd.xlane.f32.xlu1 %v634_v35 }
 0x81e   :  { %v633_v36 = vpop.xlane.xlu0 %632 }
 0x81f   :  { %v637_v37 = vmul.f32 0.03125, %v633_v36 }
 0x820   :  { %v636_v38 = vpop.xlane.xlu1 %635 }
 0x821   :  { %v639_v39 = vadd.f32 1e-05, %v637_v37  ;;  %v638_v40 = vmul.f32 0.03125, %v636_v38 }
 0x823   :  { %810 = vrsqrt.f32 %v639_v39  ;;  %v640_v41 = vadd.f32 1e-05, %v638_v40 }
 0x825   :  { %812 = vrsqrt.f32 %v640_v41 }
 0x82d   :  { %v811_v42 = vpop.eup %810 }
 0x82e   :  { %v643_v44 = vmul.f32 %v811_v42, %v627_v29 }
 0x82f   :  { %v813_v45 = vpop.eup %812 }
 0x830   :  { %v651_v47 = vmul.f32 %v694_v43, %v643_v44  ;;  %v644_v48 = vmul.f32 %v813_v45, %v628_v31 }
 0x832   :  { %v659_v49 = vadd.f32 %v695_v46, %v651_v47  ;;  %v652_v50 = vmul.f32 %v694_v43, %v644_v48 }
 0x834   :  { %v661_v51 = vadd.f32 %v659_v49, %v1018_v5  ;;  %v660_v52 = vadd.f32 %v695_v46, %v652_v50 }
 0x836   :  { %663 = vst.msk [vmem:[%s1073_s14] sm:$0xff] %vm78_vm0, %v661_v51  ;;  %v662_v53 = vadd.f32 %v660_v52, %v1021_v6 }
 0x838   :  { %664 = vst.msk [vmem:[%s1073_s14 + $0x8] sm:$0xff] %vm78_vm0, %v662_v53 }

</bundles_post_ra>
